<compile_context>
chip_gen: v7x
topology: tpu7x:2x2x1
jax: 0.10.0
libtpu: 0.0.40
codegen_flags: <defaults>
</compile_context>

<pallas_src>
import functools

import jax
import jax.numpy as jnp
from jax.experimental import pallas as pl
from jax.experimental.pallas import tpu as pltpu

_EPS = 1e-5
_LANE = 128


# ----------------------------------------------------------------------------
# JAX glue: trilinear upsample (align_corners=True) as 3 small interpolation
# matmuls (gather-free), channels-last.
# ----------------------------------------------------------------------------
def _interp_matrix(s_in, s_out):
    if s_in == 1:
        return jnp.ones((1, s_out), jnp.float32)
    pos = jnp.arange(s_out, dtype=jnp.float32) * (s_in - 1) / (s_out - 1)
    i0 = jnp.clip(jnp.floor(pos).astype(jnp.int32), 0, s_in - 2)
    w1 = pos - i0.astype(jnp.float32)
    w0 = 1.0 - w1
    rows = jnp.arange(s_in, dtype=jnp.int32)[:, None]
    return (jnp.where(rows == i0[None, :], w0[None, :], 0.0)
            + jnp.where(rows == i0[None, :] + 1, w1[None, :], 0.0))


def upsample_trilinear_cl(x_cl, scale=2):
    """x_cl: (N, D, H, W, C) channels-last -> (N, sD, sH, sW, C) float32."""
    _, D, H, W, _ = x_cl.shape
    y = jnp.einsum('ndhwc,dp->nphwc', x_cl, _interp_matrix(D, D * scale))
    y = jnp.einsum('ndhwc,hp->ndpwc', y, _interp_matrix(H, H * scale))
    y = jnp.einsum('ndhwc,wp->ndhpc', y, _interp_matrix(W, W * scale))
    return y


# ----------------------------------------------------------------------------
# Pallas kernel 1: lane-dense single-pass sum / sum-of-squares reduction.
# The per-channel fold (sum over lane groups) and mean/inv-std math are glue.
# ----------------------------------------------------------------------------
def _in_stats_kernel(x_ref, out_ref, acc_ref):
    # x_ref: (1, chunk, lane) bf16   out_ref: (1, 2, lane) f32   acc_ref: (2, lane) f32
    c = pl.program_id(1)

    @pl.when(c == 0)
    def _init():
        acc_ref[...] = jnp.zeros_like(acc_ref)

    x = x_ref[0].astype(jnp.float32)
    acc_ref[0:1, :] += jnp.sum(x, axis=0, keepdims=True)
    acc_ref[1:2, :] += jnp.sum(x * x, axis=0, keepdims=True)

    @pl.when(c == pl.num_programs(1) - 1)
    def _fin():
        out_ref[0] = acc_ref[...]


def instance_norm_stats(x2, ci, count, eps=_EPS):
    """x2: (N, rows, wuci) bf16, zero-padded rows.  Returns (mean, inv) (N, ci)."""
    N, rows, wuci = x2.shape
    if (rows * wuci) % _LANE == 0 and _LANE % ci == 0:
        lane = _LANE                                    # full lane occupancy
        xs = x2.reshape(N, rows * wuci // _LANE, _LANE)
    else:
        lane = wuci
        xs = x2
    r = xs.shape[1]
    chunk = r
    for c in range(min(r, 4096), 0, -1):                # big, 8-aligned chunks
        if r % c == 0 and (c % 8 == 0 or c == r):
            chunk = c
            break

    sums = pl.pallas_call(
        _in_stats_kernel,
        out_shape=jax.ShapeDtypeStruct((N, 2, lane), jnp.float32),
        grid=(N, r // chunk),
        in_specs=[pl.BlockSpec((1, chunk, lane), lambda n, c: (n, c, 0))],
        out_specs=pl.BlockSpec((1, 2, lane), lambda n, c: (n, 0, 0)),
        scratch_shapes=[pltpu.VMEM((2, lane), jnp.float32)],
        compiler_params=pltpu.CompilerParams(
            dimension_semantics=("parallel", "arbitrary"),
            vmem_limit_bytes=32 * 1024 * 1024),
    )(xs)

    per_c = sums.reshape(N, 2, lane // ci, ci).sum(axis=2)   # fold lane groups -> (N, 2, ci)
    mean = per_c[:, 0] * (1.0 / count)
    # TODO(synk): shifted / Welford accumulation for large-mean robustness.
    var = per_c[:, 1] * (1.0 / count) - mean * mean
    inv = jax.lax.rsqrt(var + eps)
    return mean, inv


# ----------------------------------------------------------------------------
# Pallas kernel 2: fused InstanceNorm-apply + Conv3d (valid, stride 1)
#   grid = (N, Do // T); per step: build a kd-folded normalized bf16 slab once
#   (norm hoisted), then k banded matmuls (M = T*Hu, K = k*Wu*Ci, N = cols)
#   accumulated in the VMEM-resident, lane-dense output block.
# ----------------------------------------------------------------------------
def _norm_conv_kernel(x_ref, mean_ref, inv_ref, w_ref, b_ref, o_ref, xs_ref, *, hu):
    # x_ref   : (1, rows, wuci)     bf16  whole padded instance (resident across depth blocks)
    # mean_ref: (1, 1, wuci)        f32   per-channel mean tiled along W
    # inv_ref : (1, 1, wuci)        f32   per-channel 1/sqrt(var+eps) tiled along W
    # w_ref   : (k, k*wuci, cols)   bf16  kh-indexed, kd/W-banded weights (VMEM resident)
    # b_ref   : (1, cols)           f32   bias tiled over the packed (wo, co) lane axis
    # o_ref   : (1, T*Hu, cols)     f32   lane-dense output rows for T depth planes
    # xs_ref  : (T*Hu + 8, k*wuci)  bf16  normalized, kd-folded activation slab (scratch)
    db = pl.program_id(1)
    M = o_ref.shape[1]
    R = xs_ref.shape[0]
    k = w_ref.shape[0]
    cols = b_ref.shape[1]
    wuci = mean_ref.shape[2]

    mean = mean_ref[0]                                   # (1, wuci)
    inv = inv_ref[0]

    # InstanceNorm apply hoisted out of the matmul tap loop: each kd band of
    # the slab is normalized once per step (folds the kd taps into K).
    for kd in range(k):
        src = x_ref[0, pl.ds(db * M + kd * hu, R), :].astype(jnp.float32)
        xs_ref[:, pl.ds(kd * wuci, wuci)] = ((src - mean) * inv).astype(jnp.bfloat16)

    # bias + k banded matmuls, accumulated in the VMEM output block (f32).
    o_ref[0] = jnp.broadcast_to(b_ref[...], (M, cols))
    for kh in range(k):
        o_ref[0] += jnp.dot(xs_ref[pl.ds(kh, M), :], w_ref[kh],
                            preferred_element_type=jnp.float32)


def _banded_conv_params(weight, bias, wu, wo, cols):
    """weight (Co,Ci,k,k,k), bias (Co,) ->
       wb (k, k*wu*Ci, cols) bf16 with
         wb[kh, kd*wu*Ci + w*Ci + ci, wo_*Co + co] = weight[co,ci,kd,kh,w-wo_]
       and bias_l (1, cols) f32 with bias_l[0, wo_*Co + co] = bias[co]."""
    Co, Ci, k = weight.shape[:3]
    kw_i = jnp.arange(k)[:, None, None]
    w_i = jnp.arange(wu)[None, :, None]
    wo_i = jnp.arange(wo)[None, None, :]
    sel = (w_i == wo_i + kw_i).astype(jnp.float32)                     # (k, wu, wo)
    wt = jnp.transpose(weight, (2, 3, 4, 1, 0)).astype(jnp.float32)    # (kd,kh,kw,ci,co)
    band = jnp.einsum('kwv,dhkco->hdwcvo', sel, wt)                    # (kh,kd,wu,ci,wo,co)
    band = band.reshape(k, k * wu * Ci, wo * Co)
    band = jnp.pad(band, ((0, 0), (0, 0), (0, cols - wo * Co)))
    bias_l = jnp.pad(jnp.tile(bias.astype(jnp.float32), wo),
                     (0, cols - wo * Co)).reshape(1, cols)
    return band.astype(jnp.bfloat16), bias_l


def _pick_depth_tile(do, hu, cap=256):
    """Largest divisor T of do with T*hu <= cap and 8-aligned rows."""
    good = [t for t in range(1, do + 1)
            if do % t == 0 and t * hu <= cap and (t * hu) % 8 == 0]
    return max(good) if good else do


# ----------------------------------------------------------------------------
# Full module forward + pure-JAX reference
# ----------------------------------------------------------------------------
def upsampling_forward(x, conv_w, conv_b, scale_factor=2):
    """x: (N, C_in, D, H, W) NCDHW -> (N, C_out, Do, Ho, Wo)."""
    N, Ci, D, H, W = x.shape
    Co, _, k = conv_w.shape[:3]
    s = scale_factor
    Du, Hu, Wu = D * s, H * s, W * s
    Do, Ho, Wo = Du - k + 1, Hu - k + 1, Wu - k + 1
    wuci = Wu * Ci
    cols = ((Wo * Co + _LANE - 1) // _LANE) * _LANE       # packed (wo,co) lane axis

    # 1) trilinear upsample (align_corners=True); store the 8x tensor as bf16,
    #    flattened to (N, d*h, w*ci) with 8 zero pad rows (safe for both the
    #    stats reduction and the conv kernel's kh-overflow rows).
    x_cl = jnp.transpose(x, (0, 2, 3, 4, 1))
    xu = upsample_trilinear_cl(x_cl, s)                   # (N,Du,Hu,Wu,Ci) f32
    pad_rows = 8 + ((-(Du * Hu)) % 8)
    x2 = jnp.pad(xu.astype(jnp.bfloat16).reshape(N, Du * Hu, wuci),
                 ((0, 0), (0, pad_rows), (0, 0)))

    # 2) InstanceNorm statistics (Pallas kernel 1, lane-dense reduction)
    mean, inv = instance_norm_stats(x2, Ci, float(Du * Hu * Wu))
    mean_l = jnp.tile(mean, (1, Wu)).reshape(N, 1, wuci)
    inv_l = jnp.tile(inv, (1, Wu)).reshape(N, 1, wuci)

    # 3) banded conv weights / bias (constant-folds under jit when the weights
    #    are closed over as constants; cache for static weights).
    wb, bias_l = _banded_conv_params(conv_w, conv_b, Wu, Wo, cols)

    # 4) fused InstanceNorm-apply + Conv3d (Pallas kernel 2)
    T = _pick_depth_tile(Do, Hu)
    M = T * Hu
    kernel = functools.partial(_norm_conv_kernel, hu=Hu)
    out_rows = pl.pallas_call(
        kernel,
        out_shape=jax.ShapeDtypeStruct((N, Do * Hu, cols), jnp.float32),
        grid=(N, Do // T),
        in_specs=[
            # whole (padded) instance, resident across the depth-block axis
            pl.BlockSpec((1, x2.shape[1], wuci), lambda n, d: (n, 0, 0)),
            pl.BlockSpec((1, 1, wuci), lambda n, d: (n, 0, 0)),
            pl.BlockSpec((1, 1, wuci), lambda n, d: (n, 0, 0)),
            # banded weights + bias: constant index -> VMEM resident
            pl.BlockSpec((k, k * wuci, cols), lambda n, d: (0, 0, 0)),
            pl.BlockSpec((1, cols), lambda n, d: (0, 0)),
        ],
        out_specs=pl.BlockSpec((1, M, cols), lambda n, d: (n, d, 0)),
        scratch_shapes=[pltpu.VMEM((M + 8, k * wuci), jnp.bfloat16)],
        compiler_params=pltpu.CompilerParams(
            dimension_semantics=("parallel", "arbitrary"),   # shard N across cores
            vmem_limit_bytes=32 * 1024 * 1024),
    )(x2, mean_l, inv_l, wb, bias_l)

    # Drop the k-1 garbage rows per plane and the lane padding, back to NCDHW.
    out = out_rows.reshape(N, Do, Hu, cols)[:, :, :Ho, :Wo * Co]
    out = out.reshape(N, Do, Ho, Wo, Co)
    return jnp.transpose(out, (0, 4, 1, 2, 3))


def reference_forward(x, weight, bias, scale=2, eps=_EPS):
    x_cl = jnp.transpose(x, (0, 2, 3, 4, 1))
    xu = jnp.transpose(upsample_trilinear_cl(x_cl, scale), (0, 4, 1, 2, 3))
    mean = jnp.mean(xu, axis=(2, 3, 4), keepdims=True)
    var = jnp.mean((xu - mean) ** 2, axis=(2, 3, 4), keepdims=True)
    xn = (xu - mean) * jax.lax.rsqrt(var + eps)
    Co, _, k = weight.shape[:3]
    N, _, D, H, W = xn.shape
    Do, Ho, Wo = D - k + 1, H - k + 1, W - k + 1
    out = jnp.zeros((N, Co, Do, Ho, Wo), jnp.float32) + bias[None, :, None, None, None]
    for kd in range(k):
        for kh in range(k):
            for kw in range(k):
                patch = xn[:, :, kd:kd + Do, kh:kh + Ho, kw:kw + Wo]
                out = out + jnp.einsum('ncdhw,oc->nodhw', patch,
                                       weight[:, :, kd, kh, kw])
    return out


if __name__ == "__main__":
    key = jax.random.PRNGKey(0)
    k_x, k_w, k_b = jax.random.split(key, 3)

    N, C_in, C_out = 2, 4, 8
    D = H = W = 8          # upsampled -> 16^3, conv (k=3, p=0) -> 14^3

    x = jax.random.normal(k_x, (N, C_in, D, H, W), dtype=jnp.float32)
    conv_w = 0.1 * jax.random.normal(k_w, (C_out, C_in, 3, 3, 3), dtype=jnp.float32)
    conv_b = 0.1 * jax.random.normal(k_b, (C_out,), dtype=jnp.float32)

    # Weights closed over as constants so the banded-weight preprocessing can
    # be constant-folded at compile time (static-weight deployment path).
    fwd = jax.jit(lambda xx: upsampling_forward(xx, conv_w, conv_b))
    out = jax.block_until_ready(fwd(x))

    assert out.shape == (N, C_out, 14, 14, 14), out.shape
    assert bool(jnp.all(jnp.isfinite(out)))

    ref = reference_forward(x, conv_w, conv_b)
    max_err = float(jnp.max(jnp.abs(out - ref)))
    assert max_err < 5e-2, f"max |pallas - reference| = {max_err}"

    print("KERNEL_OK")
</pallas_src>

<mosaic_0001>
module attributes {stable_mosaic.version = 11 : i64} {
  func.func @_in_stats_kernel(%arg0: i32, %arg1: i32, %arg2: memref<1x132x128xbf16, #tpu.memory_space<vmem>>, %arg3: memref<1x2x128xf32, #tpu.memory_space<vmem>>, %arg4: memref<2x128xf32, #tpu.memory_space<vmem>>) attributes {dimension_semantics = [#tpu.dimension_semantics<parallel>, #tpu.dimension_semantics<arbitrary>], iteration_bounds = array<i64: 2, 1>, scalar_prefetch = 0 : i64, scratch_operands = 1 : i64, tpu.core_type = #tpu.core_type<tc>, window_params = [{transform_indices = @transform_0, window_bounds = array<i64: 1, 132, 128>}, {transform_indices = @transform_1, window_bounds = array<i64: 1, 2, 128>}]} {
    %c0_i32 = arith.constant 0 : i32
    %0 = arith.cmpi eq, %arg1, %c0_i32 : i32
    %1 = arith.extui %0 : i1 to i32
    %c0_i32_0 = arith.constant 0 : i32
    %2 = arith.cmpi ne, %1, %c0_i32_0 : i32
    scf.if %2 {
      %cst_13 = arith.constant 0.000000e+00 : f32
      %20 = vector.broadcast %cst_13 : f32 to vector<2x128xf32>
      %c0_14 = arith.constant 0 : index
      %c0_15 = arith.constant 0 : index
      %21 = vector.load %arg4[%c0_14, %c0_15] : memref<2x128xf32, #tpu.memory_space<vmem>>, vector<2x128xf32>
      tpu.vector_store %arg4[%c0_14, %c0_15], %20 {strides = array<i32>} : memref<2x128xf32, #tpu.memory_space<vmem>>, vector<2x128xf32>,
    } else {
    }
    %c0 = arith.constant 0 : index
    %c0_1 = arith.constant 0 : index
    %c0_2 = arith.constant 0 : index
    %3 = vector.load %arg2[%c0, %c0_1, %c0_2] : memref<1x132x128xbf16, #tpu.memory_space<vmem>>, vector<1x132x128xbf16>
    %4 = vector.shape_cast %3 : vector<1x132x128xbf16> to vector<132x128xbf16>
    %5 = arith.extf %4 : vector<132x128xbf16> to vector<132x128xf32>
    %c0_3 = arith.constant 0 : index
    %c0_4 = arith.constant 0 : index
    %6 = vector.load %arg4[%c0_3, %c0_4] : memref<2x128xf32, #tpu.memory_space<vmem>>, vector<1x128xf32>
    %cst = arith.constant dense<0.000000e+00> : vector<128xf32>
    %7 = vector.multi_reduction <add>, %5, %cst [0] : vector<132x128xf32> to vector<128xf32>
    %8 = vector.shape_cast %7 : vector<128xf32> to vector<1x128xf32>
    %9 = arith.addf %6, %8 : vector<1x128xf32>
    %c0_5 = arith.constant 0 : index
    %c0_6 = arith.constant 0 : index
    %10 = vector.load %arg4[%c0_5, %c0_6] : memref<2x128xf32, #tpu.memory_space<vmem>>, vector<1x128xf32>
    tpu.vector_store %arg4[%c0_5, %c0_6], %9 {strides = array<i32>} : memref<2x128xf32, #tpu.memory_space<vmem>>, vector<1x128xf32>,
    %c1 = arith.constant 1 : index
    %c0_7 = arith.constant 0 : index
    %11 = vector.load %arg4[%c1, %c0_7] : memref<2x128xf32, #tpu.memory_space<vmem>>, vector<1x128xf32>
    %12 = arith.mulf %5, %5 : vector<132x128xf32>
    %cst_8 = arith.constant dense<0.000000e+00> : vector<128xf32>
    %13 = vector.multi_reduction <add>, %12, %cst_8 [0] : vector<132x128xf32> to vector<128xf32>
    %14 = vector.shape_cast %13 : vector<128xf32> to vector<1x128xf32>
    %15 = arith.addf %11, %14 : vector<1x128xf32>
    %c1_9 = arith.constant 1 : index
    %c0_10 = arith.constant 0 : index
    %16 = vector.load %arg4[%c1_9, %c0_10] : memref<2x128xf32, #tpu.memory_space<vmem>>, vector<1x128xf32>
    tpu.vector_store %arg4[%c1_9, %c0_10], %15 {strides = array<i32>} : memref<2x128xf32, #tpu.memory_space<vmem>>, vector<1x128xf32>,
    %c0_i32_11 = arith.constant 0 : i32
    %17 = arith.cmpi eq, %arg1, %c0_i32_11 : i32
    %18 = arith.extui %17 : i1 to i32
    %c0_i32_12 = arith.constant 0 : i32
    %19 = arith.cmpi ne, %18, %c0_i32_12 : i32
    scf.if %19 {
      %c0_13 = arith.constant 0 : index
      %c0_14 = arith.constant 0 : index
      %20 = vector.load %arg4[%c0_13, %c0_14] : memref<2x128xf32, #tpu.memory_space<vmem>>, vector<2x128xf32>
      %c0_15 = arith.constant 0 : index
      %c0_16 = arith.constant 0 : index
      %c0_17 = arith.constant 0 : index
      %21 = vector.load %arg3[%c0_15, %c0_16, %c0_17] : memref<1x2x128xf32, #tpu.memory_space<vmem>>, vector<1x2x128xf32>
      %22 = vector.shape_cast %21 : vector<1x2x128xf32> to vector<2x128xf32>
      %23 = vector.shape_cast %20 : vector<2x128xf32> to vector<1x2x128xf32>
      tpu.vector_store %arg3[%c0_15, %c0_16, %c0_17], %23 {strides = array<i32>} : memref<1x2x128xf32, #tpu.memory_space<vmem>>, vector<1x2x128xf32>,
    } else {
    }
    return
  }
  func.func @transform_0(%arg0: i32, %arg1: i32) -> (i32, i32, i32) {
    %c0_i32 = arith.constant 0 : i32
    %c0_i32_0 = arith.constant 0 : i32
    return %arg0, %arg1, %c0_i32 : i32, i32, i32
  }
  func.func @transform_1(%arg0: i32, %arg1: i32) -> (i32, i32, i32) {
    %c0_i32 = arith.constant 0 : i32
    %c0_i32_0 = arith.constant 0 : i32
    %c0_i32_1 = arith.constant 0 : i32
    return %arg0, %c0_i32, %c0_i32_0 : i32, i32, i32
  }
}

module attributes {stable_mosaic.version = 11 : i64} {
  func.func @_norm_conv_kernel(%arg0: i32, %arg1: i32, %arg2: memref<1x264x64xbf16, #tpu.memory_space<vmem>>, %arg3: memref<1x1x64xf32, #tpu.memory_space<vmem>>, %arg4: memref<1x1x64xf32, #tpu.memory_space<vmem>>, %arg5: memref<3x192x128xbf16, #tpu.memory_space<vmem>>, %arg6: memref<1x128xf32, #tpu.memory_space<vmem>>, %arg7: memref<1x224x128xf32, #tpu.memory_space<vmem>>, %arg8: memref<232x192xbf16, #tpu.memory_space<vmem>>) attributes {dimension_semantics = [#tpu.dimension_semantics<parallel>, #tpu.dimension_semantics<arbitrary>], iteration_bounds = array<i64: 2, 1>, scalar_prefetch = 0 : i64, scratch_operands = 1 : i64, tpu.core_type = #tpu.core_type<tc>, window_params = [{transform_indices = @transform_0, window_bounds = array<i64: 1, 264, 64>}, {transform_indices = @transform_1, window_bounds = array<i64: 1, 1, 64>}, {transform_indices = @transform_2, window_bounds = array<i64: 1, 1, 64>}, {pipeline_mode = #tpu.pipeline_mode<synchronous>, transform_indices = @transform_3, window_bounds = array<i64: 3, 192, 128>}, {pipeline_mode = #tpu.pipeline_mode<synchronous>, transform_indices = @transform_4, window_bounds = array<i64: 1, 128>}, {transform_indices = @transform_5, window_bounds = array<i64: 1, 224, 128>}]} {
    %c0 = arith.constant 0 : index
    %c0_0 = arith.constant 0 : index
    %c0_1 = arith.constant 0 : index
    %0 = vector.load %arg3[%c0, %c0_0, %c0_1] : memref<1x1x64xf32, #tpu.memory_space<vmem>>, vector<1x1x64xf32>
    %1 = vector.shape_cast %0 : vector<1x1x64xf32> to vector<1x64xf32>
    %c0_2 = arith.constant 0 : index
    %c0_3 = arith.constant 0 : index
    %c0_4 = arith.constant 0 : index
    %2 = vector.load %arg4[%c0_2, %c0_3, %c0_4] : memref<1x1x64xf32, #tpu.memory_space<vmem>>, vector<1x1x64xf32>
    %3 = vector.shape_cast %2 : vector<1x1x64xf32> to vector<1x64xf32>
    %c224_i32 = arith.constant 224 : i32
    %4 = arith.muli %arg1, %c224_i32 : i32
    %c0_i32 = arith.constant 0 : i32
    %5 = arith.addi %4, %c0_i32 : i32
    %c0_5 = arith.constant 0 : index
    %6 = arith.index_cast %5 : i32 to index
    %c0_6 = arith.constant 0 : index
    %7 = vector.load %arg2[%c0_5, %6, %c0_6] : memref<1x264x64xbf16, #tpu.memory_space<vmem>>, vector<1x232x64xbf16>
    %8 = vector.shape_cast %7 : vector<1x232x64xbf16> to vector<232x64xbf16>
    %9 = arith.extf %8 : vector<232x64xbf16> to vector<232x64xf32>
    %10 = vector.broadcast %1 : vector<1x64xf32> to vector<232x64xf32>
    %11 = arith.subf %9, %10 : vector<232x64xf32>
    %12 = vector.broadcast %3 : vector<1x64xf32> to vector<232x64xf32>
    %13 = arith.mulf %11, %12 : vector<232x64xf32>
    %14 = arith.truncf %13 : vector<232x64xf32> to vector<232x64xbf16>
    %c0_7 = arith.constant 0 : index
    %c0_8 = arith.constant 0 : index
    %15 = vector.load %arg8[%c0_7, %c0_8] : memref<232x192xbf16, #tpu.memory_space<vmem>>, vector<232x64xbf16>
    tpu.vector_store %arg8[%c0_7, %c0_8], %14 {strides = array<i32>} : memref<232x192xbf16, #tpu.memory_space<vmem>>, vector<232x64xbf16>,
    %c224_i32_9 = arith.constant 224 : i32
    %16 = arith.muli %arg1, %c224_i32_9 : i32
    %c16_i32 = arith.constant 16 : i32
    %17 = arith.addi %16, %c16_i32 : i32
    %c0_10 = arith.constant 0 : index
    %18 = arith.index_cast %17 : i32 to index
    %c0_11 = arith.constant 0 : index
    %19 = vector.load %arg2[%c0_10, %18, %c0_11] : memref<1x264x64xbf16, #tpu.memory_space<vmem>>, vector<1x232x64xbf16>
    %20 = vector.shape_cast %19 : vector<1x232x64xbf16> to vector<232x64xbf16>
    %21 = arith.extf %20 : vector<232x64xbf16> to vector<232x64xf32>
    %22 = vector.broadcast %1 : vector<1x64xf32> to vector<232x64xf32>
    %23 = arith.subf %21, %22 : vector<232x64xf32>
    %24 = vector.broadcast %3 : vector<1x64xf32> to vector<232x64xf32>
    %25 = arith.mulf %23, %24 : vector<232x64xf32>
    %26 = arith.truncf %25 : vector<232x64xf32> to vector<232x64xbf16>
    %c0_12 = arith.constant 0 : index
    %c64 = arith.constant 64 : index
    %27 = vector.load %arg8[%c0_12, %c64] : memref<232x192xbf16, #tpu.memory_space<vmem>>, vector<232x64xbf16>
    tpu.vector_store %arg8[%c0_12, %c64], %26 {strides = array<i32>} : memref<232x192xbf16, #tpu.memory_space<vmem>>, vector<232x64xbf16>,
    %c224_i32_13 = arith.constant 224 : i32
    %28 = arith.muli %arg1, %c224_i32_13 : i32
    %c32_i32 = arith.constant 32 : i32
    %29 = arith.addi %28, %c32_i32 : i32
    %c0_14 = arith.constant 0 : index
    %30 = arith.index_cast %29 : i32 to index
    %c0_15 = arith.constant 0 : index
    %31 = vector.load %arg2[%c0_14, %30, %c0_15] : memref<1x264x64xbf16, #tpu.memory_space<vmem>>, vector<1x232x64xbf16>
    %32 = vector.shape_cast %31 : vector<1x232x64xbf16> to vector<232x64xbf16>
    %33 = arith.extf %32 : vector<232x64xbf16> to vector<232x64xf32>
    %34 = vector.broadcast %1 : vector<1x64xf32> to vector<232x64xf32>
    %35 = arith.subf %33, %34 : vector<232x64xf32>
    %36 = vector.broadcast %3 : vector<1x64xf32> to vector<232x64xf32>
    %37 = arith.mulf %35, %36 : vector<232x64xf32>
    %38 = arith.truncf %37 : vector<232x64xf32> to vector<232x64xbf16>
    %c0_16 = arith.constant 0 : index
    %c128 = arith.constant 128 : index
    %39 = vector.load %arg8[%c0_16, %c128] : memref<232x192xbf16, #tpu.memory_space<vmem>>, vector<232x64xbf16>
    tpu.vector_store %arg8[%c0_16, %c128], %38 {strides = array<i32>} : memref<232x192xbf16, #tpu.memory_space<vmem>>, vector<232x64xbf16>,
    %c0_17 = arith.constant 0 : index
    %c0_18 = arith.constant 0 : index
    %40 = vector.load %arg6[%c0_17, %c0_18] : memref<1x128xf32, #tpu.memory_space<vmem>>, vector<1x128xf32>
    %41 = vector.shape_cast %40 : vector<1x128xf32> to vector<1x128xf32>
    %42 = vector.broadcast %41 : vector<1x128xf32> to vector<224x128xf32>
    %c0_19 = arith.constant 0 : index
    %c0_20 = arith.constant 0 : index
    %c0_21 = arith.constant 0 : index
    %43 = vector.load %arg7[%c0_19, %c0_20, %c0_21] : memref<1x224x128xf32, #tpu.memory_space<vmem>>, vector<1x224x128xf32>
    %44 = vector.shape_cast %43 : vector<1x224x128xf32> to vector<224x128xf32>
    %45 = vector.shape_cast %42 : vector<224x128xf32> to vector<1x224x128xf32>
    tpu.vector_store %arg7[%c0_19, %c0_20, %c0_21], %45 {strides = array<i32>} : memref<1x224x128xf32, #tpu.memory_space<vmem>>, vector<1x224x128xf32>,
    %c0_22 = arith.constant 0 : index
    %c0_23 = arith.constant 0 : index
    %c0_24 = arith.constant 0 : index
    %46 = vector.load %arg7[%c0_22, %c0_23, %c0_24] : memref<1x224x128xf32, #tpu.memory_space<vmem>>, vector<1x224x128xf32>
    %47 = vector.shape_cast %46 : vector<1x224x128xf32> to vector<224x128xf32>
    %c0_25 = arith.constant 0 : index
    %c0_26 = arith.constant 0 : index
    %48 = vector.load %arg8[%c0_25, %c0_26] : memref<232x192xbf16, #tpu.memory_space<vmem>>, vector<224x192xbf16>
    %c0_27 = arith.constant 0 : index
    %c0_28 = arith.constant 0 : index
    %c0_29 = arith.constant 0 : index
    %49 = vector.load %arg5[%c0_27, %c0_28, %c0_29] : memref<3x192x128xbf16, #tpu.memory_space<vmem>>, vector<1x192x128xbf16>
    %50 = vector.shape_cast %49 : vector<1x192x128xbf16> to vector<192x128xbf16>
    %cst = arith.constant dense<0.000000e+00> : vector<224x128xf32>
    %51 = tpu.matmul %48, %50, %cst {dimension_numbers = #tpu.dot_dimension_numbers<[1], [0], [0], [1], [0, 0, 1, 1], [], []>} : vector<224x192xbf16>, vector<192x128xbf16>, vector<224x128xf32> -> vector<224x128xf32>
    %52 = arith.addf %47, %51 : vector<224x128xf32>
    %c0_30 = arith.constant 0 : index
    %c0_31 = arith.constant 0 : index
    %c0_32 = arith.constant 0 : index
    %53 = vector.load %arg7[%c0_30, %c0_31, %c0_32] : memref<1x224x128xf32, #tpu.memory_space<vmem>>, vector<1x224x128xf32>
    %54 = vector.shape_cast %53 : vector<1x224x128xf32> to vector<224x128xf32>
    %55 = vector.shape_cast %52 : vector<224x128xf32> to vector<1x224x128xf32>
    tpu.vector_store %arg7[%c0_30, %c0_31, %c0_32], %55 {strides = array<i32>} : memref<1x224x128xf32, #tpu.memory_space<vmem>>, vector<1x224x128xf32>,
    %c0_33 = arith.constant 0 : index
    %c0_34 = arith.constant 0 : index
    %c0_35 = arith.constant 0 : index
    %56 = vector.load %arg7[%c0_33, %c0_34, %c0_35] : memref<1x224x128xf32, #tpu.memory_space<vmem>>, vector<1x224x128xf32>
    %57 = vector.shape_cast %56 : vector<1x224x128xf32> to vector<224x128xf32>
    %c1 = arith.constant 1 : index
    %c0_36 = arith.constant 0 : index
    %58 = vector.load %arg8[%c1, %c0_36] : memref<232x192xbf16, #tpu.memory_space<vmem>>, vector<224x192xbf16>
    %c1_37 = arith.constant 1 : index
    %c0_38 = arith.constant 0 : index
    %c0_39 = arith.constant 0 : index
    %59 = vector.load %arg5[%c1_37, %c0_38, %c0_39] : memref<3x192x128xbf16, #tpu.memory_space<vmem>>, vector<1x192x128xbf16>
    %60 = vector.shape_cast %59 : vector<1x192x128xbf16> to vector<192x128xbf16>
    %cst_40 = arith.constant dense<0.000000e+00> : vector<224x128xf32>
    %61 = tpu.matmul %58, %60, %cst_40 {dimension_numbers = #tpu.dot_dimension_numbers<[1], [0], [0], [1], [0, 0, 1, 1], [], []>} : vector<224x192xbf16>, vector<192x128xbf16>, vector<224x128xf32> -> vector<224x128xf32>
    %62 = arith.addf %57, %61 : vector<224x128xf32>
    %c0_41 = arith.constant 0 : index
    %c0_42 = arith.constant 0 : index
    %c0_43 = arith.constant 0 : index
    %63 = vector.load %arg7[%c0_41, %c0_42, %c0_43] : memref<1x224x128xf32, #tpu.memory_space<vmem>>, vector<1x224x128xf32>
    %64 = vector.shape_cast %63 : vector<1x224x128xf32> to vector<224x128xf32>
    %65 = vector.shape_cast %62 : vector<224x128xf32> to vector<1x224x128xf32>
    tpu.vector_store %arg7[%c0_41, %c0_42, %c0_43], %65 {strides = array<i32>} : memref<1x224x128xf32, #tpu.memory_space<vmem>>, vector<1x224x128xf32>,
    %c0_44 = arith.constant 0 : index
    %c0_45 = arith.constant 0 : index
    %c0_46 = arith.constant 0 : index
    %66 = vector.load %arg7[%c0_44, %c0_45, %c0_46] : memref<1x224x128xf32, #tpu.memory_space<vmem>>, vector<1x224x128xf32>
    %67 = vector.shape_cast %66 : vector<1x224x128xf32> to vector<224x128xf32>
    %c2 = arith.constant 2 : index
    %c0_47 = arith.constant 0 : index
    %68 = vector.load %arg8[%c2, %c0_47] : memref<232x192xbf16, #tpu.memory_space<vmem>>, vector<224x192xbf16>
    %c2_48 = arith.constant 2 : index
    %c0_49 = arith.constant 0 : index
    %c0_50 = arith.constant 0 : index
    %69 = vector.load %arg5[%c2_48, %c0_49, %c0_50] : memref<3x192x128xbf16, #tpu.memory_space<vmem>>, vector<1x192x128xbf16>
    %70 = vector.shape_cast %69 : vector<1x192x128xbf16> to vector<192x128xbf16>
    %cst_51 = arith.constant dense<0.000000e+00> : vector<224x128xf32>
    %71 = tpu.matmul %68, %70, %cst_51 {dimension_numbers = #tpu.dot_dimension_numbers<[1], [0], [0], [1], [0, 0, 1, 1], [], []>} : vector<224x192xbf16>, vector<192x128xbf16>, vector<224x128xf32> -> vector<224x128xf32>
    %72 = arith.addf %67, %71 : vector<224x128xf32>
    %c0_52 = arith.constant 0 : index
    %c0_53 = arith.constant 0 : index
    %c0_54 = arith.constant 0 : index
    %73 = vector.load %arg7[%c0_52, %c0_53, %c0_54] : memref<1x224x128xf32, #tpu.memory_space<vmem>>, vector<1x224x128xf32>
    %74 = vector.shape_cast %73 : vector<1x224x128xf32> to vector<224x128xf32>
    %75 = vector.shape_cast %72 : vector<224x128xf32> to vector<1x224x128xf32>
    tpu.vector_store %arg7[%c0_52, %c0_53, %c0_54], %75 {strides = array<i32>} : memref<1x224x128xf32, #tpu.memory_space<vmem>>, vector<1x224x128xf32>,
    return
  }
  func.func @transform_0(%arg0: i32, %arg1: i32) -> (i32, i32, i32) {
    %c0_i32 = arith.constant 0 : i32
    %c0_i32_0 = arith.constant 0 : i32
    %c0_i32_1 = arith.constant 0 : i32
    return %arg0, %c0_i32, %c0_i32_0 : i32, i32, i32
  }
  func.func @transform_1(%arg0: i32, %arg1: i32) -> (i32, i32, i32) {
    %c0_i32 = arith.constant 0 : i32
    %c0_i32_0 = arith.constant 0 : i32
    %c0_i32_1 = arith.constant 0 : i32
    return %arg0, %c0_i32, %c0_i32_0 : i32, i32, i32
  }
  func.func @transform_2(%arg0: i32, %arg1: i32) -> (i32, i32, i32) {
    %c0_i32 = arith.constant 0 : i32
    %c0_i32_0 = arith.constant 0 : i32
    %c0_i32_1 = arith.constant 0 : i32
    return %arg0, %c0_i32, %c0_i32_0 : i32, i32, i32
  }
  func.func @transform_3(%arg0: i32, %arg1: i32) -> (i32, i32, i32) {
    %c0_i32 = arith.constant 0 : i32
    %c0_i32_0 = arith.constant 0 : i32
    %c0_i32_1 = arith.constant 0 : i32
    %c0_i32_2 = arith.constant 0 : i32
    return %c0_i32, %c0_i32_0, %c0_i32_1 : i32, i32, i32
  }
  func.func @transform_4(%arg0: i32, %arg1: i32) -> (i32, i32) {
    %c0_i32 = arith.constant 0 : i32
    %c0_i32_0 = arith.constant 0 : i32
    %c0_i32_1 = arith.constant 0 : i32
    return %c0_i32, %c0_i32_0 : i32, i32
  }
  func.func @transform_5(%arg0: i32, %arg1: i32) -> (i32, i32, i32) {
    %c0_i32 = arith.constant 0 : i32
    %c0_i32_0 = arith.constant 0 : i32
    return %arg0, %arg1, %c0_i32 : i32, i32, i32
  }
}

</mosaic_0001>

<bundles_post_ra>
// kernel: _lambda_.2
= control target key start
LH: loop header
LB: loop body
LE: loop exit
PB: predicated region body
PF: predicated region fallthrough
CT: control target
= control target key end

     0   :  { %s433_s6 = smov 0   ;;  %s435_s7 = smov 0   ;;  %s481_s0 = inlined_call_operand.vmem [shape: bf16[2,132,128], index: 0, kind: input, shape index: {}]   ;;  %s482_s1 = inlined_call_operand.vmem [shape: f32[2,2,128], index: 1, kind: output, shape index: {}]  }
   0x1   :  { %s437_s8 = smov 0  }
   0x2 LB: > { %s23_s9 = sadd.s32 1, %s416_s7  ;;  %p328_p0 = scmp.ge.s32.totalorder %s420_s8, 1  ;;  %s420_s8 = sphi %s437_s8, %s11_s8   ;;  %s416_s7 = sphi %s435_s7, %s484_s7   ;;  %s412_s6 = sphi %s433_s6, %s483_s6  }
   0x3   : > { %p25_p1 = scmp.ge.s32.totalorder %s23_s9, 2  ;;  %p106_p2 = scmp.lt.s32.totalorder %s420_s8, 3 }
   0x5   : > { %s486_s9 = smov (%p25_p1, %s23_s9), 0  ;;  %p107_p3 = pnand %p328_p0, %p106_p2 }
   0x6   : > { %p130_p4 = scmp.lt.s32.totalorder (!%p107_p3), %s412_s6, 1  ;;  %v422_v0 = vmov (!%p107_p3), 0.0   ;;  %vm198_vm0 = vcmask (!%p107_p3), 1043456  }
   0x7   : > { %110 = sbr.rel (%p107_p3) target bundleno = 78 (0x4e), region = 24  ;;  %147 = vst [vmem:[#allocation2] sm:$0x3] (!%p107_p3), %v422_v0 }
   0xe   : > { %s488_s6 = smov (!%p130_p4, %s412_s6), 1 }
   0xf   : > { %s372_s10 = smul.u32 68, %s488_s6  ;;  %s330_s14 = sshll.u32 %s488_s6, 1 }
  0x10   : > { %s142_s17 = scalar_lea.vmem %s482_s1, %s330_s14 }
  0x11   : > { %s457_s13 = scalar_lea.vmem %s481_s0, %s372_s10 }
  0x12   : > { %v334_v1 = vld [vmem:[%s457_s13] sm:$0xff]   ;;  %v365_v2 = vld [vmem:[%s457_s13 + $0x8] sm:$0xff]   ;;  %v366_v6 = vld [vmem:[%s457_s13 + $0x10] sm:$0xff]  }
  0x13   : > { %v335_v3 = vunpack.c.l.bf16 %v334_v1  ;;  %v336_v4 = vunpack.c.h.bf16 %v334_v1  ;;  %v339_v5 = vunpack.c.l.bf16 %v365_v2  ;;  %v340_v8 = vunpack.c.h.bf16 %v365_v2  ;;  %v367_v14 = vld [vmem:[%s457_s13 + $0x18] sm:$0xff]   ;;  %v368_v23 = vld [vmem:[%s457_s13 + $0x20] sm:$0xff]   ;;  %v369_v32 = vld [vmem:[%s457_s13 + $0x28] sm:$0xff]  }
  0x14   : > { %v343_v12 = vunpack.c.l.bf16 %v366_v6  ;;  %v344_v16 = vunpack.c.h.bf16 %v366_v6  ;;  %v347_v20 = vunpack.c.l.bf16 %v367_v14  ;;  %v348_v25 = vunpack.c.h.bf16 %v367_v14  ;;  %v370_v41 = vld [vmem:[%s457_s13 + $0x30] sm:$0xff]   ;;  %v371_v50 = vld [vmem:[%s457_s13 + $0x38] sm:$0xff]   ;;  %v164_v53 = vld [vmem:[%s457_s13 + $0x40] sm:$0x3] }
  0x15   : > { %v183_v7 = vadd.f32 %v336_v4, %v335_v3  ;;  %v210_v9 = vmul.f32 %v335_v3, %v335_v3  ;;  %v211_v10 = vmul.f32 %v336_v4, %v336_v4  ;;  %v212_v13 = vmul.f32 %v339_v5, %v339_v5 }
  0x16   : > { %v213_v17 = vmul.f32 %v340_v8, %v340_v8  ;;  %v214_v21 = vmul.f32 %v343_v12, %v343_v12  ;;  %v215_v26 = vmul.f32 %v344_v16, %v344_v16  ;;  %v351_v29 = vunpack.c.l.bf16 %v368_v23 }
  0x17   : > { %v184_v11 = vadd.f32 %v339_v5, %v183_v7  ;;  %v227_v18 = vadd.f32 %v211_v10, %v210_v9  ;;  %v216_v30 = vmul.f32 %v347_v20, %v347_v20  ;;  %v352_v34 = vunpack.c.h.bf16 %v368_v23 }
  0x18   : > { %v217_v35 = vmul.f32 %v348_v25, %v348_v25  ;;  %v355_v38 = vunpack.c.l.bf16 %v369_v32  ;;  %v218_v39 = vmul.f32 %v351_v29, %v351_v29  ;;  %v356_v43 = vunpack.c.h.bf16 %v369_v32 }
  0x19   : > { %v185_v15 = vadd.f32 %v340_v8, %v184_v11  ;;  %v228_v22 = vadd.f32 %v227_v18, %v212_v13  ;;  %v219_v44 = vmul.f32 %v352_v34, %v352_v34  ;;  %v359_v47 = vunpack.c.l.bf16 %v370_v41 }
  0x1a   : > { %v220_v48 = vmul.f32 %v355_v38, %v355_v38  ;;  %v360_v52 = vunpack.c.h.bf16 %v370_v41  ;;  %v221_v54 = vmul.f32 %v356_v43, %v356_v43  ;;  %v363_v57 = vunpack.c.l.bf16 %v371_v50 }
  0x1b   : > { %v186_v19 = vadd.f32 %v343_v12, %v185_v15  ;;  %v229_v27 = vadd.f32 %v228_v22, %v213_v17  ;;  %v222_v58 = vmul.f32 %v359_v47, %v359_v47  ;;  %v181_v60 = vunpack.c.l.bf16 %v164_v53 }
  0x1c   : > { %v364_v62 = vunpack.c.h.bf16 %v371_v50  ;;  %v223_v63 = vmul.f32 %v360_v52, %v360_v52  ;;  %v224_v3 = vmul.f32 %v363_v57, %v363_v57 }
  0x1d   : > { %v187_v24 = vadd.f32 %v344_v16, %v186_v19  ;;  %v230_v31 = vadd.f32 %v229_v27, %v214_v21  ;;  %v199_v2 = vsel %vm198_vm0, %v181_v60, 0.0  ;;  %v226_v6 = vmul.f32 %v181_v60, %v181_v60  ;;  %v182_v21 = vld [vmem:[#allocation2] sm:$0x1]  ;;  %v209_v27 = vld [vmem:[#allocation2 + $0x1] sm:$0x1] }
  0x1e   : > { %v225_v7 = vmul.f32 %v364_v62, %v364_v62 }
  0x1f   : > { %v188_v28 = vadd.f32 %v347_v20, %v187_v24  ;;  %v231_v36 = vadd.f32 %v230_v31, %v215_v26  ;;  %v242_v12 = vsel %vm198_vm0, %v226_v6, 0.0 }
  0x21   : > { %v189_v33 = vadd.f32 %v348_v25, %v188_v28  ;;  %v232_v40 = vadd.f32 %v231_v36, %v216_v30 }
  0x23   : > { %v190_v37 = vadd.f32 %v351_v29, %v189_v33  ;;  %v233_v45 = vadd.f32 %v232_v40, %v217_v35 }
  0x25   : > { %v191_v42 = vadd.f32 %v352_v34, %v190_v37  ;;  %v234_v49 = vadd.f32 %v233_v45, %v218_v39 }
  0x27   : > { %v192_v46 = vadd.f32 %v355_v38, %v191_v42  ;;  %v235_v55 = vadd.f32 %v234_v49, %v219_v44 }
  0x29   : > { %v193_v51 = vadd.f32 %v356_v43, %v192_v46  ;;  %v236_v59 = vadd.f32 %v235_v55, %v220_v48 }
  0x2b   : > { %v194_v56 = vadd.f32 %v359_v47, %v193_v51  ;;  %v237_v0 = vadd.f32 %v236_v59, %v221_v54 }
  0x2d   : > { %v195_v61 = vadd.f32 %v360_v52, %v194_v56  ;;  %v238_v4 = vadd.f32 %v237_v0, %v222_v58 }
  0x2f   : > { %v196_v1 = vadd.f32 %v363_v57, %v195_v61  ;;  %v239_v8 = vadd.f32 %v238_v4, %v223_v63 }
  0x31   : > { %v197_v5 = vadd.f32 %v364_v62, %v196_v1  ;;  %v240_v10 = vadd.f32 %v239_v8, %v224_v3 }
  0x33   : > { %v200_v9 = vadd.f32 %v199_v2, %v197_v5  ;;  %v241_v13 = vadd.f32 %v240_v10, %v225_v7 }
  0x35   : > { %v201_v11 = vrot.slane %v200_v9, 4  ;;  %v243_v15 = vadd.f32 %v242_v12, %v241_v13 }
  0x37   : > { %v202_v14 = vadd.f32 %v201_v11, %v200_v9  ;;  %v244_v17 = vrot.slane %v243_v15, 4 }
  0x39   : > { %v203_v16 = vrot.slane %v202_v14, 2  ;;  %v245_v19 = vadd.f32 %v244_v17, %v243_v15 }
  0x3b   : > { %v204_v18 = vadd.f32 %v203_v16, %v202_v14  ;;  %v246_v22 = vrot.slane %v245_v19, 2 }
  0x3d   : > { %v205_v20 = vrot.slane %v204_v18, 1  ;;  %v247_v24 = vadd.f32 %v246_v22, %v245_v19 }
  0x3f   : > { %v206_v23 = vadd.f32 %v205_v20, %v204_v18  ;;  %v248_v26 = vrot.slane %v247_v24, 1 }
  0x41   : > { %v207_v25 = vadd.f32 %v206_v23, %v182_v21  ;;  %v249_v28 = vadd.f32 %v248_v26, %v247_v24 }
  0x43   : > { %208 = vst [vmem:[#allocation2] sm:$0x1] %v207_v25  ;;  %v250_v29 = vadd.f32 %v249_v28, %v209_v27 }
  0x45   : > { %251 = vst [vmem:[#allocation2 + $0x1] sm:$0x1] %v250_v29 }
  0x4c   : > { %v255_v30 = vld [vmem:[#allocation2] sm:$0x3] }
  0x4d   : > { %256 = vst [vmem:[%s142_s17] sm:$0x3] %v255_v30 }
  0x4e PF: > { %s11_s8 = sadd.s32 1, %s420_s8   ;;  %s483_s6 = smov %s416_s7 }
  0x4f   : > { %p8_p5 = scmp.ge.s32.totalorder %s11_s8, 4   ;;  %s484_s7 = smov %s486_s9 }
  0x51   :  { %10 = sbr.rel (!%p8_p5) target bundleno = 2 (0x2), region = 62 }

// kernel: tile.26
= control target key start
LH: loop header
LB: loop body
LE: loop exit
PB: predicated region body
PF: predicated region fallthrough
CT: control target
= control target key end

     0   :  { %s28_s0 = inlined_call_operand.vmem [shape: f32[8], index: 0, kind: input, shape index: {}]   ;;  %s29_s1 = inlined_call_operand.vmem [shape: f32[14,8], index: 1, kind: output, shape index: {}]  }
   0x1   :  { %v4_v0 = vld [vmem:[%s28_s0] ss:$0 sm:$0xff] }
   0x2   :  { %5 = vst [vmem:[%s29_s1] sm:$0xff] %v4_v0  ;;  %8 = vst [vmem:[%s29_s1 + $0x8] sm:$0xff] %v4_v0 }

// kernel: tile.27
= control target key start
LH: loop header
LB: loop body
LE: loop exit
PB: predicated region body
PF: predicated region fallthrough
CT: control target
= control target key end

     0   :  { %s115_s10 = smov 104   ;;  %s116_s11 = smov 88   ;;  %vm3_vm0 = vcmask 64512   ;;  %vm9_vm1 = vcmask 917312   ;;  %vm15_vm2 = vcmask 851712   ;;  %vm21_vm3 = vcmask 786112   ;;  %s183_s0 = inlined_call_operand.vmem [shape: f32[14,8], index: 0, kind: input, shape index: {}]   ;;  %s184_s1 = inlined_call_operand.vmem [shape: f32[112], index: 1, kind: output, shape index: {}]  }
   0x1   :  { %v89_v0 = vld [vmem:[%s183_s0 + $0xd] sm:$0x1]   ;;  %v91_v1 = vld [vmem:[%s183_s0 + $0xb] sm:$0x1]   ;;  %v90_v2 = vld [vmem:[%s183_s0 + $0xc] sm:$0x1]  }
   0x2   :  { %7 = vrot.lane.b32.xlu0 %v89_v0, %s115_s10  ;;  %19 = vrot.lane.b32.xlu1 %v91_v1, %s116_s11  ;;  %v92_v3 = vld [vmem:[%s183_s0 + $0xa] sm:$0x1]   ;;  %s117_s16 = smov 96   ;;  %s118_s17 = smov 80   ;;  %v93_v4 = vld [vmem:[%s183_s0 + $0x9] sm:$0x1]  }
   0x3   :  { %v94_v5 = vld [vmem:[%s183_s0 + $0x8] sm:$0x1]   ;;  %v2_v6 = vld [vmem:[%s183_s0] sm:$0x1]   ;;  %s119_s24 = smov 72   ;;  %s120_s25 = smov 64  }
   0x4   :  { %4 = vst.msk [vmem:[#allocation0] sm:$0x1] %vm3_vm0, %v2_v6   ;;  %v95_v7 = vld [vmem:[%s183_s0 + $0x7] sm:$0x1]   ;;  %v96_v8 = vld [vmem:[%s183_s0 + $0x6] sm:$0x1]  }
   0x5   :  { %s121_s30 = smov 56   ;;  %s122_s2 = smov 48   ;;  %v97_v9 = vld [vmem:[%s183_s0 + $0x5] sm:$0x1]   ;;  %v98_v10 = vld [vmem:[%s183_s0 + $0x4] sm:$0x1]  }
   0x6   :  { %13 = vrot.lane.b32.xlu0 %v90_v2, %s117_s16  ;;  %25 = vrot.lane.b32.xlu1 %v92_v3, %s118_s17  ;;  %s123_s7 = smov 40   ;;  %s124_s8 = smov 32   ;;  %v99_v11 = vld [vmem:[%s183_s0 + $0x3] sm:$0x1]   ;;  %v100_v12 = vld [vmem:[%s183_s0 + $0x2] sm:$0x1]  }
   0x7   :  { %s125_s13 = smov 24   ;;  %s126_s14 = smov 16   ;;  %v101_v13 = vld [vmem:[%s183_s0 + $0x1] sm:$0x1]   ;;  %vm27_vm4 = vcmask 720512   ;;  %vm33_vm5 = vcmask 654912  }
   0x8   :  { %s127_s0 = smov 8   ;;  %vm39_vm6 = vcmask 589312   ;;  %vm45_vm7 = vcmask 523712   ;;  %vm51_vm8 = vcmask 458112   ;;  %vm57_vm9 = vcmask 392512  }
   0x9   :  { %vm63_vm10 = vcmask 326912   ;;  %vm69_vm11 = vcmask 261312   ;;  %vm75_vm12 = vcmask 195712   ;;  %vm81_vm13 = vcmask 130112  }
   0xa   :  { %31 = vrot.lane.b32.xlu0 %v93_v4, %s119_s24  ;;  %37 = vrot.lane.b32.xlu1 %v94_v5, %s120_s25 }
   0xe   :  { %43 = vrot.lane.b32.xlu0 %v95_v7, %s121_s30  ;;  %49 = vrot.lane.b32.xlu1 %v96_v8, %s122_s2 }
  0x12   :  { %55 = vrot.lane.b32.xlu0 %v97_v9, %s123_s7  ;;  %61 = vrot.lane.b32.xlu1 %v98_v10, %s124_s8 }
  0x16   :  { %67 = vrot.lane.b32.xlu0 %v99_v11, %s125_s13  ;;  %73 = vrot.lane.b32.xlu1 %v100_v12, %s126_s14 }
  0x1a   :  { %79 = vrot.lane.b32.xlu0 %v101_v13, %s127_s0 }
  0x74   :  { %v8_v14 = vpop.permute.xlu0 %7   ;;  %v20_v15 = vpop.permute.xlu1 %19  }
  0x75   :  { %10 = vst.msk [vmem:[#allocation0] sm:$0x1] %vm9_vm1, %v8_v14  }
  0x78   :  { %v14_v16 = vpop.permute.xlu0 %13   ;;  %v26_v17 = vpop.permute.xlu1 %25  }
  0x79   :  { %16 = vst.msk [vmem:[#allocation0] sm:$0x1] %vm15_vm2, %v14_v16  }
  0x7a   :  { %22 = vst.msk [vmem:[#allocation0] sm:$0x1] %vm21_vm3, %v20_v15  }
  0x7b   :  { %28 = vst.msk [vmem:[#allocation0] sm:$0x1] %vm27_vm4, %v26_v17  }
  0x7c   :  { %v32_v18 = vpop.permute.xlu0 %31   ;;  %v38_v19 = vpop.permute.xlu1 %37  }
  0x7d   :  { %34 = vst.msk [vmem:[#allocation0] sm:$0x1] %vm33_vm5, %v32_v18  }
  0x7e   :  { %40 = vst.msk [vmem:[#allocation0] sm:$0x1] %vm39_vm6, %v38_v19  }
  0x80   :  { %v44_v20 = vpop.permute.xlu0 %43   ;;  %v50_v21 = vpop.permute.xlu1 %49  }
  0x81   :  { %46 = vst.msk [vmem:[#allocation0] sm:$0x1] %vm45_vm7, %v44_v20  }
  0x82   :  { %52 = vst.msk [vmem:[#allocation0] sm:$0x1] %vm51_vm8, %v50_v21  }
  0x84   :  { %v56_v22 = vpop.permute.xlu0 %55   ;;  %v62_v23 = vpop.permute.xlu1 %61  }
  0x85   :  { %58 = vst.msk [vmem:[#allocation0] sm:$0x1] %vm57_vm9, %v56_v22  }
  0x86   :  { %64 = vst.msk [vmem:[#allocation0] sm:$0x1] %vm63_vm10, %v62_v23  }
  0x88   :  { %v68_v24 = vpop.permute.xlu0 %67   ;;  %v74_v25 = vpop.permute.xlu1 %73  }
  0x89   :  { %70 = vst.msk [vmem:[#allocation0] sm:$0x1] %vm69_vm11, %v68_v24  }
  0x8a   :  { %76 = vst.msk [vmem:[#allocation0] sm:$0x1] %vm75_vm12, %v74_v25  }
  0x8c   :  { %v80_v26 = vpop.permute.xlu0 %79  }
  0x8d   :  { %82 = vst.msk [vmem:[#allocation0] sm:$0x1] %vm81_vm13, %v80_v26  }
  0x94   :  { %v86_v27 = vld [vmem:[#allocation0] sm:$0x1] }
  0x95   :  { %88 = vst [vmem:[%s184_s1] sm:$0x1] %v86_v27 }

// kernel: _lambda_.3
= control target key start
LH: loop header
LB: loop body
LE: loop exit
PB: predicated region body
PF: predicated region fallthrough
CT: control target
= control target key end

     0   :  { %s4212_s18 = smov 0   ;;  %s4214_s19 = smov 0   ;;  %s5079_s0 = inlined_call_operand.vmem [shape: bf16[2,264,64], index: 0, kind: input, shape index: {}]   ;;  %s5080_s1 = inlined_call_operand.vmem [shape: f32[2,1,64], index: 1, kind: input, shape index: {}]   ;;  %s5081_s2 = inlined_call_operand.vmem [shape: f32[2,1,64], index: 2, kind: input, shape index: {}]   ;;  %s5082_s3 = inlined_call_operand.vmem [shape: bf16[3,192,128], index: 3, kind: input, shape index: {}]   ;;  %s5083_s4 = inlined_call_operand.vmem [shape: f32[1,128], index: 4, kind: input, shape index: {}]   ;;  %s5084_s5 = inlined_call_operand.vmem [shape: f32[2,224,128], index: 5, kind: output, shape index: {}]  }
   0x1   :  { %s4216_s20 = smov 0  }
   0x2 LB: > { %s27_s21 = sadd.s32 1, %s4174_s19  ;;  %p3166_p0 = scmp.ge.s32.totalorder %s4178_s20, 1  ;;  %s4178_s20 = sphi %s4216_s20, %s15_s20   ;;  %s4174_s19 = sphi %s4214_s19, %s5086_s19   ;;  %s4170_s18 = sphi %s4212_s18, %s5085_s18  }
   0x3   : > { %p29_p1 = scmp.ge.s32.totalorder %s27_s21, 2  ;;  %p217_p2 = scmp.lt.s32.totalorder %s4178_s20, 3 }
   0x5   : > { %s5088_s21 = smov (%p29_p1, %s27_s21), 0  ;;  %p218_p3 = pnand %p3166_p0, %p217_p2 }
   0x6   : > { %p255_p4 = scmp.lt.s32.totalorder (!%p218_p3), %s4170_s18, 1  ;;  %v4077_v0 = vld [vmem:[%s5082_s3] sm:$0xff] (!%p218_p3)   ;;  %v4180_v1 = vmov (!%p218_p3), 0   ;;  %v4078_v2 = vld [vmem:[%s5082_s3 + $0x8] sm:$0xff] (!%p218_p3)   ;;  %v4079_v5 = vld [vmem:[%s5082_s3 + $0x10] sm:$0xff] (!%p218_p3)   ;;  %vm529_vm0 = vcmask (!%p218_p3), 519168  }
   0x7   : > { %221 = sbr.rel (%p218_p3) target bundleno = 541 (0x21d), region = 40  ;;  %1508 = vmatprep.subr.bf16.mxu1 (!%p218_p3), %v4180_v1  ;;  %2269 = vmatprep.subr.bf16.mxu0 (!%p218_p3), %v4180_v1  ;;  %v4249_v3 = vld [vmem:[%s5082_s3 + $0x60] sm:$0xff] (!%p218_p3)   ;;  %v4275_v14 = vld [vmem:[%s5082_s3 + $0x68] sm:$0xff] (!%p218_p3)   ;;  %v4081_v24 = vld [vmem:[%s5082_s3 + $0x18] sm:$0xff] (!%p218_p3)   ;;  %s4181_s27 = smov (!%p218_p3), 64   ;;  %vm855_vm1 = vcmask (!%p218_p3), 1043968  }
   0x8   : > { %1509 = vmatpush1.bf16.msra.mxu1 (!%p218_p3), %v4077_v0  ;;  %2270 = vmatpush1.bf16.msra.mxu0 (!%p218_p3), %v4249_v3  ;;  %v4306_v39 = vld [vmem:[%s5082_s3 + $0x70] sm:$0xff] (!%p218_p3)   ;;  %v4083_v44 = vld [vmem:[%s5082_s3 + $0x20] sm:$0xff] (!%p218_p3)   ;;  %v4085_v58 = vld [vmem:[%s5082_s3 + $0x28] sm:$0xff] (!%p218_p3)   ;;  %vm1465_vm2 = vcmask (!%p218_p3), 523264   ;;  %vm1908_vm3 = vsmask.f32 (!%p218_p3), 7424 }
   0x9   : > { %1510 = vmatprep.subr.bf16.mxu1 (!%p218_p3), %v4180_v1  ;;  %2271 = vmatprep.subr.bf16.mxu0 (!%p218_p3), %v4180_v1  ;;  %v4349_v59 = vld [vmem:[%s5082_s3 + $0x78] sm:$0xff] (!%p218_p3)   ;;  %vm2669_vm4 = vcmask (!%p218_p3), 1046528  }
   0xc   : > { %1511 = vmatpush1.bf16.msra.mxu1 (!%p218_p3), %v4078_v2  ;;  %2272 = vmatpush1.bf16.msra.mxu0 (!%p218_p3), %v4275_v14 }
   0xd   : > { %1512 = vmatprep.subr.bf16.mxu1 (!%p218_p3), %v4180_v1  ;;  %2273 = vmatprep.subr.bf16.mxu0 (!%p218_p3), %v4180_v1 }
   0xe   : > { %s5090_s18 = smov (!%p255_p4, %s4170_s18), 1 }
   0xf   : > { %s4049_s26 = smul.u32 132, %s5090_s18  ;;  %s262_s29 = scalar_lea.vmem %s5080_s1, %s5090_s18 }
  0x10   : > { %s265_s12 = scalar_lea.vmem %s5081_s2, %s5090_s18  ;;  %v4260_v4 = vld [vmem:[%s262_s29] ss:$0 sm:$0xff]  ;;  %1513 = vmatpush1.bf16.msra.mxu1 %v4079_v5  ;;  %2274 = vmatpush1.bf16.msra.mxu0 %v4306_v39  ;;  %s4050_s22 = smul.u32 224, %s5090_s18 }
  0x11   : > { %s4254_s9 = scalar_lea.vmem %s5079_s0, %s4049_s26  ;;  %v4277_v15 = vld [vmem:[%s265_s12] ss:$0 sm:$0xff]  ;;  %1514 = vmatprep.subr.bf16.mxu1 %v4180_v1  ;;  %2275 = vmatprep.subr.bf16.mxu0 %v4180_v1 }
  0x12   : > { %v3802_v6 = vld [vmem:[%s4254_s9 + $0x10] sm:$0xff]   ;;  %v3801_v7 = vld [vmem:[%s4254_s9 + $0x8] sm:$0xff]   ;;  %v3803_v8 = vld [vmem:[%s4254_s9 + $0x18] sm:$0xff]   ;;  %s5011_s28 = scalar_lea.vmem %s5084_s5, %s4050_s22 }
  0x13   : > { %v3682_v9 = vunpack.c.l.bf16 %v3802_v6  ;;  %v3683_v10 = vunpack.c.h.bf16 %v3802_v6  ;;  %v3678_v11 = vunpack.c.l.bf16 %v3801_v7  ;;  %v3679_v12 = vunpack.c.h.bf16 %v3801_v7  ;;  %v3804_v13 = vld [vmem:[%s4254_s9 + $0x20] sm:$0xff]   ;;  %v3805_v33 = vld [vmem:[%s4254_s9 + $0x28] sm:$0xff]   ;;  %v3806_v38 = vld [vmem:[%s4254_s9 + $0x30] sm:$0xff]  }
  0x14   : > { %v3687_v16 = vunpack.c.h.bf16 %v3803_v8  ;;  %v3686_v17 = vunpack.c.l.bf16 %v3803_v8  ;;  %v3691_v18 = vunpack.c.h.bf16 %v3804_v13  ;;  %v3690_v19 = vunpack.c.l.bf16 %v3804_v13  ;;  %1515 = vmatpush1.bf16.msra.mxu1 %v4081_v24  ;;  %v3807_v53 = vld [vmem:[%s4254_s9 + $0x38] sm:$0xff]   ;;  %v3808_v0 = vld [vmem:[%s4254_s9 + $0x40] sm:$0xff]   ;;  %v4087_v8 = vld [vmem:[%s5082_s3 + $0x30] sm:$0xff]   ;;  %2276 = vmatpush1.bf16.msra.mxu0 %v4349_v59 }
  0x15   : > { %v624_v20 = vsub.f32 %v3682_v9, %v4260_v4  ;;  %v622_v21 = vsub.f32 %v3678_v11, %v4260_v4  ;;  %v625_v22 = vsub.f32 %v3683_v10, %v4260_v4  ;;  %v623_v23 = vsub.f32 %v3679_v12, %v4260_v4  ;;  %1516 = vmatprep.subr.bf16.mxu1 %v4180_v1  ;;  %v4368_v10 = vld [vmem:[%s5082_s3 + $0x80] sm:$0xff]  }
  0x16   : > { %v627_v25 = vsub.f32 %v3687_v16, %v4260_v4  ;;  %v626_v26 = vsub.f32 %v3686_v17, %v4260_v4  ;;  %v629_v27 = vsub.f32 %v3691_v18, %v4260_v4  ;;  %v628_v28 = vsub.f32 %v3690_v19, %v4260_v4  ;;  %2277 = vmatprep.subr.bf16.mxu0 %v4180_v1  ;;  %v3809_v17 = vld [vmem:[%s4254_s9 + $0x48] sm:$0xff]   ;;  %v4089_v18 = vld [vmem:[%s5082_s3 + $0x38] sm:$0xff]  }
  0x17   : > { %v653_v29 = vmul.f32 %v4277_v15, %v624_v20  ;;  %v651_v30 = vmul.f32 %v4277_v15, %v622_v21  ;;  %v654_v31 = vmul.f32 %v4277_v15, %v625_v22  ;;  %v652_v32 = vmul.f32 %v4277_v15, %v623_v23  ;;  %v3810_v22 = vld [vmem:[%s4254_s9 + $0x50] sm:$0xff]   ;;  %v4402_v23 = vld [vmem:[%s5082_s3 + $0x88] sm:$0xff]  }
  0x18   : > { %v656_v34 = vmul.f32 %v4277_v15, %v627_v25  ;;  %v655_v35 = vmul.f32 %v4277_v15, %v626_v26  ;;  %v658_v36 = vmul.f32 %v4277_v15, %v629_v27  ;;  %v657_v37 = vmul.f32 %v4277_v15, %v628_v28  ;;  %1517 = vmatpush1.bf16.msra.mxu1 %v4083_v44  ;;  %v3621_v26 = vld [vmem:[%s4254_s9] sm:$0xff]   ;;  %v3811_v28 = vld [vmem:[%s4254_s9 + $0x58] sm:$0xff]  }
  0x19   : > { %v3564_v40 = vpack.c.bf16 %v653_v29, %v653_v29  ;;  %v3562_v41 = vpack.c.bf16 %v651_v30, %v651_v30  ;;  %v3565_v42 = vpack.c.bf16 %v654_v31, %v654_v31  ;;  %v3563_v43 = vpack.c.bf16 %v652_v32, %v652_v32  ;;  %1518 = vmatprep.subr.bf16.mxu1 %v4180_v1  ;;  %v4091_v29 = vld [vmem:[%s5082_s3 + $0x40] sm:$0xff]  }
  0x1a   : > { %v3567_v45 = vpack.c.bf16 %v656_v34, %v656_v34  ;;  %v3566_v46 = vpack.c.bf16 %v655_v35, %v655_v35  ;;  %v4311_v47 = vpack.c.bf16 %v658_v36, %v658_v36  ;;  %v4313_v48 = vpack.c.bf16 %v657_v37, %v657_v37  ;;  %2278 = vmatpush1.bf16.msra.mxu0 %v4368_v10  ;;  %v4426_v34 = vld [vmem:[%s5082_s3 + $0x90] sm:$0xff]   ;;  %v4093_v36 = vld [vmem:[%s5082_s3 + $0x48] sm:$0xff]  }
  0x1b   : > { %772 = vrot.lane.b32.xlu1 %v3564_v40, %s4181_s27  ;;  %768 = vrot.lane.b32.xlu0 %v3562_v41, %s4181_s27  ;;  %v3695_v49 = vunpack.c.h.bf16 %v3805_v33  ;;  %v3694_v50 = vunpack.c.l.bf16 %v3805_v33  ;;  %v3699_v51 = vunpack.c.h.bf16 %v3806_v38  ;;  %v3698_v52 = vunpack.c.l.bf16 %v3806_v38  ;;  %532 = vst.msk [vmem:[#allocation2 + $0x10] sm:$0xf] %vm529_vm0, %v3562_v41  ;;  %533 = vst.msk [vmem:[#allocation2 + $0x18] sm:$0xf] %vm529_vm0, %v3563_v43  ;;  %v4421_v33 = vld [vmem:[%s4254_s9 + $0x60] sm:$0xff]  }
  0x1c   : > { %535 = vst.msk [vmem:[#allocation2 + $0x28] sm:$0xf] %vm529_vm0, %v3565_v42  ;;  %534 = vst.msk [vmem:[#allocation2 + $0x20] sm:$0xf] %vm529_vm0, %v3564_v40  ;;  %v3703_v7 = vunpack.c.h.bf16 %v3807_v53  ;;  %1519 = vmatpush1.bf16.msra.mxu1 %v4085_v58  ;;  %v3702_v11 = vunpack.c.l.bf16 %v3807_v53  ;;  %v3707_v12 = vunpack.c.h.bf16 %v3808_v0  ;;  %v3706_v13 = vunpack.c.l.bf16 %v3808_v0  ;;  %2279 = vmatprep.subr.bf16.mxu0 %v4180_v1 }
  0x1d   : > { %1123 = vst.msk [vmem:[#allocation2 + $0x4] sm:$0xf] %vm529_vm0, %v3564_v40  ;;  %1124 = vst.msk [vmem:[#allocation2 + $0xc] sm:$0xf] %vm529_vm0, %v3565_v42  ;;  %v631_v54 = vsub.f32 %v3695_v49, %v4260_v4  ;;  %v630_v55 = vsub.f32 %v3694_v50, %v4260_v4  ;;  %v633_v56 = vsub.f32 %v3699_v51, %v4260_v4  ;;  %1520 = vmatprep.subr.bf16.mxu1 %v4180_v1  ;;  %v3794_v51 = vld [vmem:[%s4254_s9 + $0x38] sm:$0xff]  }
  0x1e   : > { %537 = vst.msk [vmem:[#allocation2 + $0x38] sm:$0xf] %vm529_vm0, %v3567_v45  ;;  %536 = vst.msk [vmem:[#allocation2 + $0x30] sm:$0xf] %vm529_vm0, %v3566_v46  ;;  %v632_v57 = vsub.f32 %v3698_v52, %v4260_v4  ;;  %v635_v16 = vsub.f32 %v3703_v7, %v4260_v4  ;;  %v634_v19 = vsub.f32 %v3702_v11, %v4260_v4  ;;  %v3711_v25 = vunpack.c.h.bf16 %v3809_v17 }
  0x1f   : > { %1125 = vst.msk [vmem:[#allocation2 + $0x14] sm:$0xf] %vm529_vm0, %v3566_v46  ;;  %1126 = vst.msk [vmem:[#allocation2 + $0x1c] sm:$0xf] %vm529_vm0, %v3567_v45  ;;  %774 = vrot.lane.b32.xlu1 %v3565_v42, %s4181_s27  ;;  %770 = vrot.lane.b32.xlu0 %v3563_v43, %s4181_s27  ;;  %v660_v60 = vmul.f32 %v4277_v15, %v631_v54  ;;  %v659_v61 = vmul.f32 %v4277_v15, %v630_v55  ;;  %v3710_v27 = vunpack.c.l.bf16 %v3809_v17  ;;  %v4095_v55 = vld [vmem:[%s5082_s3 + $0x50] sm:$0xff]  }
  0x20   : > { %1127 = vst.msk [vmem:[#allocation2 + $0x24] sm:$0xf] %vm529_vm0, %v4313_v48  ;;  %1128 = vst.msk [vmem:[#allocation2 + $0x2c] sm:$0xf] %vm529_vm0, %v4311_v47  ;;  %v662_v62 = vmul.f32 %v4277_v15, %v633_v56  ;;  %v661_v63 = vmul.f32 %v4277_v15, %v632_v57  ;;  %1521 = vmatpush1.bf16.msra.mxu1 %v4087_v8  ;;  %v637_v20 = vsub.f32 %v3707_v12, %v4260_v4 }
  0x21   : > { %539 = vst.msk [vmem:[#allocation2 + $0x48] sm:$0xf] %vm529_vm0, %v4311_v47  ;;  %538 = vst.msk [vmem:[#allocation2 + $0x40] sm:$0xf] %vm529_vm0, %v4313_v48  ;;  %v3571_v2 = vpack.c.bf16 %v660_v60, %v660_v60  ;;  %v3570_v5 = vpack.c.bf16 %v659_v61, %v659_v61  ;;  %v636_v21 = vsub.f32 %v3706_v13, %v4260_v4  ;;  %1522 = vmatprep.subr.bf16.mxu1 %v4180_v1 }
  0x22   : > { %v4359_v6 = vpack.c.bf16 %v662_v62, %v662_v62  ;;  %v3572_v9 = vpack.c.bf16 %v661_v63, %v661_v63  ;;  %v664_v24 = vmul.f32 %v4277_v15, %v635_v16  ;;  %v663_v30 = vmul.f32 %v4277_v15, %v634_v19  ;;  %2280 = vmatpush1.bf16.msra.mxu0 %v4402_v23  ;;  %v3795_v62 = vld [vmem:[%s4254_s9 + $0x40] sm:$0xff]  }
  0x23   : > { %778 = vrot.lane.b32.xlu1 %v3567_v45, %s4181_s27  ;;  %776 = vrot.lane.b32.xlu0 %v3566_v46, %s4181_s27  ;;  %541 = vst.msk [vmem:[#allocation2 + $0x58] sm:$0xf] %vm529_vm0, %v3571_v2  ;;  %540 = vst.msk [vmem:[#allocation2 + $0x50] sm:$0xf] %vm529_vm0, %v3570_v5  ;;  %v4415_v31 = vmul.f32 %v4277_v15, %v637_v20  ;;  %v4418_v32 = vmul.f32 %v4277_v15, %v636_v21  ;;  %v3622_v35 = vunpack.c.l.bf16 %v3621_v26  ;;  %v4440_v45 = vld [vmem:[%s5082_s3 + $0x98] sm:$0xff]   ;;  %v4480_v16 = vld [vmem:[%s5082_s3 + $0xa0] sm:$0xff]  }
  0x24   : > { %1129 = vst.msk [vmem:[#allocation2 + $0x34] sm:$0xf] %vm529_vm0, %v3570_v5  ;;  %1130 = vst.msk [vmem:[#allocation2 + $0x3c] sm:$0xf] %vm529_vm0, %v3571_v2  ;;  %1523 = vmatpush1.bf16.msra.mxu1 %v4089_v18  ;;  %v3623_v37 = vunpack.c.h.bf16 %v3621_v26  ;;  %v3575_v38 = vpack.c.bf16 %v664_v24, %v664_v24  ;;  %v639_v40 = vsub.f32 %v3711_v25, %v4260_v4  ;;  %v3715_v41 = vunpack.c.h.bf16 %v3810_v22  ;;  %v3813_v26 = vld [vmem:[%s4254_s9 + $0x68] sm:$0xff]  }
  0x25   : > { %543 = vst.msk [vmem:[#allocation2 + $0x68] sm:$0xf] %vm529_vm0, %v4359_v6  ;;  %1132 = vst.msk [vmem:[#allocation2 + $0x4c] sm:$0xf] %vm529_vm0, %v4359_v6  ;;  %1524 = vmatprep.subr.bf16.mxu1 %v4180_v1  ;;  %2281 = vmatprep.subr.bf16.mxu0 %v4180_v1  ;;  %v638_v42 = vsub.f32 %v3710_v27, %v4260_v4  ;;  %v3714_v43 = vunpack.c.l.bf16 %v3810_v22  ;;  %v348_v44 = vsub.f32 %v3622_v35, %v4260_v4  ;;  %v4097_v27 = vld [vmem:[%s5082_s3 + $0x58] sm:$0xff]  }
  0x26   : > { %542 = vst.msk [vmem:[#allocation2 + $0x60] sm:$0xf] %vm529_vm0, %v3572_v9  ;;  %1131 = vst.msk [vmem:[#allocation2 + $0x44] sm:$0xf] %vm529_vm0, %v3572_v9  ;;  %v349_v46 = vsub.f32 %v3623_v37, %v4260_v4  ;;  %v3576_v49 = vpack.c.bf16 %v4418_v32, %v4418_v32  ;;  %v3719_v50 = vunpack.c.h.bf16 %v3811_v28  ;;  %v3718_v52 = vunpack.c.l.bf16 %v3811_v28  ;;  %2282 = vmatpush1.bf16.msra.mxu0 %v4426_v34 }
  0x27   : > { %782 = vrot.lane.b32.xlu1 %v4311_v47, %s4181_s27  ;;  %780 = vrot.lane.b32.xlu0 %v4313_v48, %s4181_s27  ;;  %v3574_v47 = vpack.c.bf16 %v663_v30, %v663_v30  ;;  %v3577_v48 = vpack.c.bf16 %v4415_v31, %v4415_v31  ;;  %v3723_v53 = vunpack.c.h.bf16 %v4421_v33  ;;  %v383_v54 = vmul.f32 %v4277_v15, %v348_v44 }
  0x28   : > { %1525 = vmatpush1.bf16.msra.mxu1 %v4091_v29  ;;  %v3651_v56 = vunpack.c.h.bf16 %v3794_v51  ;;  %v4459_v57 = vmul.f32 %v4277_v15, %v639_v40  ;;  %v641_v58 = vsub.f32 %v3715_v41, %v4260_v4  ;;  %2283 = vmatprep.subr.bf16.mxu0 %v4180_v1  ;;  %v384_v60 = vmul.f32 %v4277_v15, %v349_v46  ;;  %v3822_v29 = vld [vmem:[%s4254_s9 + $0x48] sm:$0xff]  }
  0x29   : > { %1526 = vmatprep.subr.bf16.mxu1 %v4180_v1  ;;  %v3650_v61 = vunpack.c.l.bf16 %v3794_v51  ;;  %v667_v63 = vmul.f32 %v4277_v15, %v638_v42  ;;  %v640_v0 = vsub.f32 %v3714_v43, %v4260_v4  ;;  %v3655_v8 = vunpack.c.h.bf16 %v3795_v62 }
  0x2a   : > { %v643_v11 = vsub.f32 %v3719_v50, %v4260_v4  ;;  %v642_v12 = vsub.f32 %v3718_v52, %v4260_v4  ;;  %v3722_v13 = vunpack.c.l.bf16 %v4421_v33  ;;  %2284 = vmatpush1.bf16.msra.mxu0 %v4440_v45  ;;  %v3579_v18 = vpack.c.bf16 %v4459_v57, %v4459_v57  ;;  %v3814_v52 = vld [vmem:[%s4254_s9 + $0x70] sm:$0xff]  }
  0x2b   : > { %786 = vrot.lane.b32.xlu1 %v3571_v2, %s4181_s27  ;;  %784 = vrot.lane.b32.xlu0 %v3570_v5, %s4181_s27  ;;  %v3533_v2 = vpack.c.bf16 %v383_v54, %v383_v54  ;;  %v363_v5 = vsub.f32 %v3651_v56, %v4260_v4  ;;  %v362_v7 = vsub.f32 %v3650_v61, %v4260_v4  ;;  %v3762_v33 = vunpack.c.l.bf16 %v3822_v29 }
  0x2c   : > { %1527 = vmatpush1.bf16.msra.mxu1 %v4093_v36  ;;  %2285 = vmatprep.subr.bf16.mxu0 %v4180_v1  ;;  %v365_v20 = vsub.f32 %v3655_v8, %v4260_v4  ;;  %v3578_v22 = vpack.c.bf16 %v667_v63, %v667_v63  ;;  %v670_v24 = vmul.f32 %v4277_v15, %v641_v58  ;;  %v4507_v36 = vld [vmem:[%s5082_s3 + $0xa8] sm:$0xff]   ;;  %v3763_v37 = vunpack.c.h.bf16 %v3822_v29 }
  0x2d   : > { %530 = vst.msk [vmem:[#allocation2] sm:$0xf] %vm529_vm0, %v3533_v2  ;;  %1528 = vmatprep.subr.bf16.mxu1 %v4180_v1  ;;  %v398_v17 = vmul.f32 %v4277_v15, %v363_v5  ;;  %v397_v19 = vmul.f32 %v4277_v15, %v362_v7  ;;  %v669_v25 = vmul.f32 %v4277_v15, %v640_v0  ;;  %v3726_v50 = vunpack.c.l.bf16 %v3813_v26  ;;  %v3228_v5 = vld [vmem:[%s4254_s9 + $0x78] sm:$0xf] }
  0x2e   : > { %v400_v31 = vmul.f32 %v4277_v15, %v365_v20  ;;  %v645_v35 = vsub.f32 %v3723_v53, %v4260_v4  ;;  %2286 = vmatpush1.bf16.msra.mxu0 %v4480_v16  ;;  %v962_v42 = vsub.f32 %v3762_v33, %v4260_v4  ;;  %v672_v43 = vmul.f32 %v4277_v15, %v643_v11  ;;  %v4532_v53 = vld [vmem:[%s5082_s3 + $0xb0] sm:$0xff]  }
  0x2f   : > { %790 = vrot.lane.b32.xlu1 %v4359_v6, %s4181_s27  ;;  %788 = vrot.lane.b32.xlu0 %v3572_v9, %s4181_s27  ;;  %v3534_v6 = vpack.c.bf16 %v384_v60, %v384_v60  ;;  %v3654_v9 = vunpack.c.l.bf16 %v3795_v62  ;;  %v3548_v28 = vpack.c.bf16 %v398_v17, %v398_v17  ;;  %v3547_v30 = vpack.c.bf16 %v397_v19, %v397_v19 }
  0x30   : > { %1529 = vmatpush1.bf16.msra.mxu1 %v4095_v55  ;;  %2287 = vmatprep.subr.bf16.mxu0 %v4180_v1  ;;  %v3550_v40 = vpack.c.bf16 %v400_v31, %v400_v31  ;;  %v671_v44 = vmul.f32 %v4277_v15, %v642_v12  ;;  %v644_v46 = vsub.f32 %v3722_v13, %v4260_v4  ;;  %v3731_v0 = vunpack.c.h.bf16 %v3814_v52 }
  0x31   : > { %531 = vst.msk [vmem:[#allocation2 + $0x8] sm:$0xf] %vm529_vm0, %v3534_v6  ;;  %v364_v21 = vsub.f32 %v3654_v9, %v4260_v4  ;;  %1530 = vmatprep.subr.bf16.mxu1 %v4180_v1  ;;  %545 = vst.msk [vmem:[#allocation2 + $0x78] sm:$0xf] %vm529_vm0, %v3548_v28  ;;  %v991_v51 = vmul.f32 %v4277_v15, %v962_v42  ;;  %v674_v55 = vmul.f32 %v4277_v15, %v645_v35  ;;  %v4549_v6 = vld [vmem:[%s5082_s3 + $0xb8] sm:$0xff]  }
  0x32   : > { %1134 = vst.msk [vmem:[#allocation2 + $0x5c] sm:$0xf] %vm529_vm0, %v3548_v28  ;;  %544 = vst.msk [vmem:[#allocation2 + $0x70] sm:$0xf] %vm529_vm0, %v3547_v30  ;;  %2288 = vmatpush1.bf16.msra.mxu0 %v4507_v36  ;;  %v3583_v57 = vpack.c.bf16 %v672_v43, %v672_v43  ;;  %v673_v58 = vmul.f32 %v4277_v15, %v644_v46  ;;  %v3582_v62 = vpack.c.bf16 %v671_v44, %v671_v44 }
  0x33   : > { %794 = vrot.lane.b32.xlu1 %v3575_v38, %s4181_s27  ;;  %792 = vrot.lane.b32.xlu0 %v3574_v47, %s4181_s27  ;;  %v399_v32 = vmul.f32 %v4277_v15, %v364_v21  ;;  %v3727_v38 = vunpack.c.h.bf16 %v3813_v26  ;;  %1133 = vst.msk [vmem:[#allocation2 + $0x54] sm:$0xf] %vm529_vm0, %v3547_v30  ;;  %v963_v47 = vsub.f32 %v3763_v37, %v4260_v4  ;;  %547 = vst.msk [vmem:[#allocation2 + $0x88] sm:$0xf] %vm529_vm0, %v3550_v40 }
  0x34   : > { %1531 = vmatpush1.bf16.msra.mxu1 %v4097_v27  ;;  %1136 = vst.msk [vmem:[#allocation2 + $0x6c] sm:$0xf] %vm529_vm0, %v3550_v40  ;;  %2289 = vmatprep.subr.bf16.mxu0 %v4180_v1  ;;  %v3605_v56 = vpack.c.bf16 %v991_v51, %v991_v51  ;;  %v646_v63 = vsub.f32 %v3726_v50, %v4260_v4  ;;  %v3730_v2 = vunpack.c.l.bf16 %v3814_v52  ;;  %v621_v11 = vunpack.c.l.bf16 %v3228_v5  ;;  %v3798_v40 = vld [vmem:[%s4254_s9 + $0x58] sm:$0xff]   ;;  %v3799_v50 = vld [vmem:[%s4254_s9 + $0x60] sm:$0xff]  }
  0x35   : > { %v3549_v41 = vpack.c.bf16 %v399_v32, %v399_v32  ;;  %3829 = vmatprep.subr.bf16.mxu1 %v4180_v1  ;;  %v992_v54 = vmul.f32 %v4277_v15, %v963_v47  ;;  %v647_v60 = vsub.f32 %v3727_v38, %v4260_v4  ;;  %v3585_v7 = vpack.c.bf16 %v674_v55, %v674_v55 }
  0x36   : > { %1137 = vst.msk [vmem:[#allocation2 + $0x74] sm:$0xf] %vm529_vm0, %v3605_v56  ;;  %548 = vst.msk [vmem:[#allocation2 + $0x90] sm:$0xf] %vm529_vm0, %v3605_v56  ;;  %2290 = vmatpush1.bf16.msra.mxu0 %v4532_v53  ;;  %v3584_v8 = vpack.c.bf16 %v673_v58, %v673_v58  ;;  %v675_v12 = vmul.f32 %v4277_v15, %v646_v63  ;;  %v649_v13 = vsub.f32 %v3731_v0, %v4260_v4 }
  0x37   : > { %798 = vrot.lane.b32.xlu1 %v3577_v48, %s4181_s27  ;;  %796 = vrot.lane.b32.xlu0 %v3576_v49, %s4181_s27  ;;  %v3581_v48 = vpack.c.bf16 %v670_v24, %v670_v24  ;;  %v3580_v49 = vpack.c.bf16 %v669_v25, %v669_v25  ;;  %546 = vst.msk [vmem:[#allocation2 + $0x80] sm:$0xf] %vm529_vm0, %v3549_v41  ;;  %1135 = vst.msk [vmem:[#allocation2 + $0x64] sm:$0xf] %vm529_vm0, %v3549_v41  ;;  %v3667_v41 = vunpack.c.h.bf16 %v3798_v40 }
  0x38   : > { %v3606_v61 = vpack.c.bf16 %v992_v54, %v992_v54  ;;  %2291 = vmatprep.subr.bf16.mxu0 %v4180_v1  ;;  %v676_v9 = vmul.f32 %v4277_v15, %v647_v60  ;;  %v648_v17 = vsub.f32 %v3730_v2, %v4260_v4  ;;  %v3586_v26 = vpack.c.bf16 %v675_v12, %v675_v12 }
  0x39   : > { %v678_v27 = vmul.f32 %v4277_v15, %v649_v13  ;;  %v3666_v42 = vunpack.c.l.bf16 %v3798_v40  ;;  %v371_v43 = vsub.f32 %v3667_v41, %v4260_v4  ;;  %v3671_v51 = vunpack.c.h.bf16 %v3799_v50 }
  0x3a   : > { %1138 = vst.msk [vmem:[#allocation2 + $0x7c] sm:$0xf] %vm529_vm0, %v3606_v61  ;;  %549 = vst.msk [vmem:[#allocation2 + $0x98] sm:$0xf] %vm529_vm0, %v3606_v61  ;;  %2292 = vmatpush1.bf16.msra.mxu0 %v4549_v6  ;;  %v3587_v21 = vpack.c.bf16 %v676_v9, %v676_v9  ;;  %v677_v28 = vmul.f32 %v4277_v15, %v648_v17  ;;  %v3670_v52 = vunpack.c.l.bf16 %v3799_v50  ;;  %v3800_v61 = vld [vmem:[%s4254_s9 + $0x68] sm:$0xff]  }
  0x3b   : > { %802 = vrot.lane.b32.xlu1 %v3579_v18, %s4181_s27  ;;  %800 = vrot.lane.b32.xlu0 %v3578_v22, %s4181_s27  ;;  %v3797_v18 = vld [vmem:[%s4254_s9 + $0x50] sm:$0xff]   ;;  %v650_v22 = vsub.f32 %v621_v11, %v4260_v4  ;;  %v3589_v33 = vpack.c.bf16 %v678_v27, %v678_v27  ;;  %v370_v44 = vsub.f32 %v3666_v42, %v4260_v4  ;;  %v3674_v63 = vunpack.c.l.bf16 %v3800_v61 }
  0x3c   : > { %v3663_v19 = vunpack.c.h.bf16 %v3797_v18  ;;  %v3662_v20 = vunpack.c.l.bf16 %v3797_v18  ;;  %2856 = vmatprep.subr.bf16.mxu0 %v4180_v1  ;;  %v3588_v35 = vpack.c.bf16 %v677_v28, %v677_v28  ;;  %v406_v46 = vmul.f32 %v4277_v15, %v371_v43  ;;  %v3827_v11 = vld [vmem:[%s4254_s9 + $0x70] sm:$0xff]   ;;  %v3828_v28 = vld [vmem:[%s4254_s9 + $0x78] sm:$0xff]  }
  0x3d   : > { %v679_v37 = vmul.f32 %v4277_v15, %v650_v22  ;;  %v405_v47 = vmul.f32 %v4277_v15, %v370_v44  ;;  %v373_v54 = vsub.f32 %v3671_v51, %v4260_v4  ;;  %v372_v55 = vsub.f32 %v3670_v52, %v4260_v4  ;;  %v312_v17 = vld [vmem:[%s4254_s9 + $0x70] ss:$16 sps:$4 sm:$0xff]  }
  0x3e   : > { %v369_v24 = vsub.f32 %v3663_v19, %v4260_v4  ;;  %v368_v25 = vsub.f32 %v3662_v20, %v4260_v4  ;;  %v374_v2 = vsub.f32 %v3674_v63, %v4260_v4  ;;  %v3782_v12 = vunpack.c.l.bf16 %v3827_v11 }
  0x3f   : > { %806 = vrot.lane.b32.xlu1 %v3581_v48, %s4181_s27  ;;  %804 = vrot.lane.b32.xlu0 %v3580_v49, %s4181_s27  ;;  %v3590_v38 = vpack.c.bf16 %v679_v37, %v679_v37  ;;  %v3556_v48 = vpack.c.bf16 %v406_v46, %v406_v46  ;;  %v3555_v49 = vpack.c.bf16 %v405_v47, %v405_v47  ;;  %v3783_v13 = vunpack.c.h.bf16 %v3827_v11 }
  0x40   : > { %v404_v29 = vmul.f32 %v4277_v15, %v369_v24  ;;  %v403_v30 = vmul.f32 %v4277_v15, %v368_v25  ;;  %v408_v56 = vmul.f32 %v4277_v15, %v373_v54  ;;  %v972_v18 = vsub.f32 %v3782_v12, %v4260_v4 }
  0x41   : > { %553 = vst.msk [vmem:[#allocation2 + $0xb8] sm:$0xf] %vm529_vm0, %v3556_v48  ;;  %552 = vst.msk [vmem:[#allocation2 + $0xb0] sm:$0xf] %vm529_vm0, %v3555_v49  ;;  %v973_v19 = vsub.f32 %v3783_v13, %v4260_v4  ;;  %v341_v20 = vunpack.c.l.bf16 %v312_v17  ;;  %v947_v41 = vunpack.c.h.bf16 %v312_v17 }
  0x42   : > { %v3554_v31 = vpack.c.bf16 %v404_v29, %v404_v29  ;;  %v3553_v32 = vpack.c.bf16 %v403_v30, %v403_v30  ;;  %1141 = vst.msk [vmem:[#allocation2 + $0x94] sm:$0xf] %vm529_vm0, %v3555_v49  ;;  %1142 = vst.msk [vmem:[#allocation2 + $0x9c] sm:$0xf] %vm529_vm0, %v3556_v48  ;;  %v3558_v58 = vpack.c.bf16 %v408_v56, %v408_v56  ;;  %v3786_v29 = vunpack.c.l.bf16 %v3828_v28 }
  0x43   : > { %810 = vrot.lane.b32.xlu1 %v3583_v57, %s4181_s27  ;;  %808 = vrot.lane.b32.xlu0 %v3582_v62, %s4181_s27  ;;  %v407_v57 = vmul.f32 %v4277_v15, %v372_v55  ;;  %v3675_v62 = vunpack.c.h.bf16 %v3800_v61  ;;  %v1002_v22 = vmul.f32 %v4277_v15, %v973_v19  ;;  %v376_v24 = vsub.f32 %v341_v20, %v4260_v4  ;;  %v4638_v55 = vld [vmem:[#allocation2 + $0x14] ss:$8 sps:$4 sm:$0xff]  }
  0x44   : > { %551 = vst.msk [vmem:[#allocation2 + $0xa8] sm:$0xf] %vm529_vm0, %v3554_v31  ;;  %550 = vst.msk [vmem:[#allocation2 + $0xa0] sm:$0xf] %vm529_vm0, %v3553_v32  ;;  %v3787_v30 = vunpack.c.h.bf16 %v3828_v28  ;;  %v976_v42 = vsub.f32 %v947_v41, %v4260_v4  ;;  %v4661_v28 = vld [vmem:[#allocation2 + $0x34] ss:$8 sps:$4 sm:$0xff]  }
  0x45   : > { %1139 = vst.msk [vmem:[#allocation2 + $0x84] sm:$0xf] %vm529_vm0, %v3553_v32  ;;  %1140 = vst.msk [vmem:[#allocation2 + $0x8c] sm:$0xf] %vm529_vm0, %v3554_v31  ;;  %v3557_v60 = vpack.c.bf16 %v407_v57, %v407_v57  ;;  %v375_v0 = vsub.f32 %v3675_v62, %v4260_v4  ;;  %v411_v27 = vmul.f32 %v4277_v15, %v376_v24 }
  0x46   : > { %555 = vst.msk [vmem:[#allocation2 + $0xc8] sm:$0xf] %vm529_vm0, %v3558_v58  ;;  %1144 = vst.msk [vmem:[#allocation2 + $0xac] sm:$0xf] %vm529_vm0, %v3558_v58  ;;  %v974_v32 = vsub.f32 %v3786_v29, %v4260_v4  ;;  %v1005_v43 = vmul.f32 %v4277_v15, %v976_v42 }
  0x47   : > { %814 = vrot.lane.b32.xlu1 %v3585_v7, %s4181_s27  ;;  %812 = vrot.lane.b32.xlu0 %v3584_v8, %s4181_s27  ;;  %554 = vst.msk [vmem:[#allocation2 + $0xc0] sm:$0xf] %vm529_vm0, %v3557_v60  ;;  %1143 = vst.msk [vmem:[#allocation2 + $0xa4] sm:$0xf] %vm529_vm0, %v3557_v60  ;;  %v410_v5 = vmul.f32 %v4277_v15, %v375_v0  ;;  %v409_v7 = vmul.f32 %v4277_v15, %v374_v2  ;;  %v1929_v60 = vshll.u32 %v4638_v55, 16 }
  0x48   : > { %v3561_v31 = vpack.c.bf16 %v411_v27, %v411_v27  ;;  %v3619_v44 = vpack.c.bf16 %v1005_v43, %v1005_v43 }
  0x49   : > { %v3560_v8 = vpack.c.bf16 %v410_v5, %v410_v5  ;;  %v3559_v9 = vpack.c.bf16 %v409_v7, %v409_v7  ;;  %v1931_v63 = vrot.slane %v1929_v60, 1  ;;  %v4649_v7 = vld [vmem:[#allocation2 + $0x24] ss:$8 sps:$4 sm:$0xff]  }
  0x4a   : > { %558 = vst.msk [vmem:[#allocation2 + $0xe0] sm:$0xf] %vm529_vm0, %v3561_v31  ;;  %1151 = vst.msk [vmem:[#allocation2 + $0xe4] sm:$0xf] %vm529_vm0, %v3619_v44  ;;  %v1945_v19 = vshll.u32 %v4649_v7, 16  ;;  %v4108_v31 = vld [vmem:[%s5082_s3 + $0xc0] sm:$0xff]  }
  0x4b   : > { %818 = vrot.lane.b32.xlu1 %v3587_v21, %s4181_s27  ;;  %816 = vrot.lane.b32.xlu0 %v3586_v26, %s4181_s27  ;;  %557 = vst.msk [vmem:[#allocation2 + $0xd8] sm:$0xf] %vm529_vm0, %v3560_v8  ;;  %556 = vst.msk [vmem:[#allocation2 + $0xd0] sm:$0xf] %vm529_vm0, %v3559_v9  ;;  %v1001_v21 = vmul.f32 %v4277_v15, %v972_v18  ;;  %v3616_v26 = vpack.c.bf16 %v1002_v22, %v1002_v22  ;;  %v1941_v18 = vshrl.u32 %v4638_v55, 16 }
  0x4c   : > { %1145 = vst.msk [vmem:[#allocation2 + $0xb4] sm:$0xf] %vm529_vm0, %v3559_v9  ;;  %1146 = vst.msk [vmem:[#allocation2 + $0xbc] sm:$0xf] %vm529_vm0, %v3560_v8 }
  0x4d   : > { %v3615_v25 = vpack.c.bf16 %v1001_v21, %v1001_v21  ;;  %1148 = vst.msk [vmem:[#allocation2 + $0xcc] sm:$0xf] %vm529_vm0, %v3616_v26  ;;  %v1943_v24 = vor.u32 %v1941_v18, %v1931_v63 }
  0x4f   : > { %822 = vrot.lane.b32.xlu1 %v3589_v33, %s4181_s27  ;;  %820 = vrot.lane.b32.xlu0 %v3588_v35, %s4181_s27  ;;  %1147 = vst.msk [vmem:[#allocation2 + $0xc4] sm:$0xf] %vm529_vm0, %v3615_v25  ;;  %v975_v33 = vsub.f32 %v3787_v30, %v4260_v4  ;;  %v1003_v35 = vmul.f32 %v4277_v15, %v974_v32  ;;  %v1947_v25 = vrot.slane %v1945_v19, 1 }
  0x51   : > { %v1004_v37 = vmul.f32 %v4277_v15, %v975_v33  ;;  %v1948_v32 = vsel %vm1908_vm3, %v1943_v24, %v1947_v25 }
  0x53   : > { %824 = vrot.lane.b32.xlu0 %v3590_v38, %s4181_s27  ;;  %v3617_v38 = vpack.c.bf16 %v1003_v35, %v1003_v35  ;;  %v3618_v40 = vpack.c.bf16 %v1004_v37, %v1004_v37  ;;  %v1957_v35 = vshrl.u32 %v4649_v7, 16 }
  0x55   : > { %1149 = vst.msk [vmem:[#allocation2 + $0xd4] sm:$0xf] %vm529_vm0, %v3617_v38  ;;  %1150 = vst.msk [vmem:[#allocation2 + $0xdc] sm:$0xf] %vm529_vm0, %v3618_v40  ;;  %v4109_v40 = vld [vmem:[%s5082_s3 + $0xc8] sm:$0xff]   ;;  %v1959_v44 = vor.u32 %v1957_v35, %v1947_v25 }
  0x8d   : > { %v773_v46 = vpop.permute.xlu1 %772  ;;  %v769_v47 = vpop.permute.xlu0 %768 }
  0x8e   : > { %858 = vst.msk [vmem:[#allocation2 + $0x10] sm:$0xf] %vm855_vm1, %v773_v46  ;;  %856 = vst.msk [vmem:[#allocation2] sm:$0xf] %vm855_vm1, %v769_v47  ;;  %v4691_v47 = vld [vmem:[#allocation2 + $0x44] ss:$8 sps:$4 sm:$0xff]  }
  0x8f   : > { %v1989_v19 = vshrl.u32 %v4691_v47, 16 }
  0x91   : > { %v775_v48 = vpop.permute.xlu1 %774  ;;  %v771_v49 = vpop.permute.xlu0 %770 }
  0x92   : > { %859 = vst.msk [vmem:[#allocation2 + $0x18] sm:$0xf] %vm855_vm1, %v775_v48  ;;  %857 = vst.msk [vmem:[#allocation2 + $0x8] sm:$0xf] %vm855_vm1, %v771_v49 }
  0x95   : > { %v779_v50 = vpop.permute.xlu1 %778  ;;  %v777_v4 = vpop.permute.xlu0 %776  ;;  %v1215_v15 = vld [vmem:[#allocation2] sm:$0xff] }
  0x96   : > { %861 = vst.msk [vmem:[#allocation2 + $0x28] sm:$0xf] %vm855_vm1, %v779_v50  ;;  %860 = vst.msk [vmem:[#allocation2 + $0x20] sm:$0xf] %vm855_vm1, %v777_v4  ;;  %v4112_v4 = vld [vmem:[%s5082_s3 + $0xd0] sm:$0xff]  }
  0x99   : > { %v4636_v51 = vld [vmem:[#allocation2 + $0x8] sm:$0xff]  ;;  %v783_v52 = vpop.permute.xlu1 %782  ;;  %v781_v54 = vpop.permute.xlu0 %780  ;;  %v4644_v58 = vld [vmem:[#allocation2 + $0x10] ss:$8 sps:$4 sm:$0xff]  }
  0x9a   : > { %v3317_v56 = vcombine.low %v1215_v15, %v4636_v51  ;;  %v3318_v57 = vcombine.high %v1215_v15, %v4636_v51  ;;  %863 = vst.msk [vmem:[#allocation2 + $0x38] sm:$0xf] %vm855_vm1, %v783_v52  ;;  %862 = vst.msk [vmem:[#allocation2 + $0x30] sm:$0xf] %vm855_vm1, %v781_v54  ;;  %v1917_v0 = vshll.u32 %v4644_v58, 16  ;;  %v1933_v41 = vshrl.u32 %v4644_v58, 16 }
  0x9c   : > { %3357 = vmatprep.mubr.msk.bf16.mxu1 %vm1465_vm2, %v3318_v57  ;;  %v1924_v61 = vshll.u32 %v3318_v57, 16  ;;  %v1912_v62 = vshll.u32 %v3317_v56, 16  ;;  %v1922_v11 = vshrl.u32 %v3318_v57, 16  ;;  %v1910_v13 = vshrl.u32 %v3317_v56, 16 }
  0x9d   : > { %1541 = vmatmul.mubr.bf16.vlgmr.msra.gmra.mrb[0].mxu1 %v3317_v56  ;;  %v1741_v2 = vld [vmem:[#allocation2 + $0x20] sm:$0xff]  ;;  %v1742_v5 = vld [vmem:[#allocation2 + $0x28] sm:$0xff]  ;;  %v787_v8 = vpop.permute.xlu1 %786  ;;  %v785_v9 = vpop.permute.xlu0 %784  ;;  %v1919_v22 = vrot.slane %v1917_v0, 1  ;;  %v1973_v56 = vshrl.u32 %v4661_v28, 16  ;;  %v1977_v57 = vshll.u32 %v4691_v47, 16 }
  0x9e   : > { %3841 = vmatpush1.bf16.msra.mxu1 %v4249_v3  ;;  %3358 = vmatprep.mubr.msk.bf16.mxu1 %vm1465_vm2, %v4638_v55  ;;  %v1926_v12 = vrot.slane %v1924_v61, 1  ;;  %v1914_v17 = vrot.slane %v1912_v62, 1  ;;  %865 = vst.msk [vmem:[#allocation2 + $0x48] sm:$0xf] %vm855_vm1, %v787_v8  ;;  %864 = vst.msk [vmem:[#allocation2 + $0x40] sm:$0xf] %vm855_vm1, %v785_v9  ;;  %v4659_v20 = vcombine.low %v1741_v2, %v1742_v5 }
  0x9f   : > { %3830 = vmatprep.subr.bf16.mxu1 %v4180_v1  ;;  %v1935_v48 = vor.u32 %v1933_v41, %v1919_v22  ;;  %v1979_v5 = vrot.slane %v1977_v57, 1  ;;  %v4721_v8 = vld [vmem:[#allocation2 + $0x54] ss:$8 sps:$4 sm:$0xff]  }
  0xa0   : > { %v1927_v3 = vor.u32 %v1926_v12, %v1922_v11  ;;  %v1915_v21 = vor.u32 %v1914_v17, %v1910_v13  ;;  %v1937_v33 = vshll.u32 %v4659_v20, 16  ;;  %v1949_v15 = vshrl.u32 %v4659_v20, 16  ;;  %v4117_v12 = vld [vmem:[%s5082_s3 + $0xe0] sm:$0xff]  }
  0xa1   : > { %v791_v26 = vpop.permute.xlu1 %790  ;;  %v789_v27 = vpop.permute.xlu0 %788  ;;  %v4689_v43 = vld [vmem:[#allocation2 + $0x30] ss:$8 sps:$4 sm:$0xff]  }
  0xa2   : > { %v1932_v29 = vsel %vm1908_vm3, %v1927_v3, %v1931_v63  ;;  %v1920_v30 = vsel %vm1908_vm3, %v1915_v21, %v1919_v22  ;;  %3842 = vmatpush1.bf16.msra.mxu1 %v4275_v14  ;;  %867 = vst.msk [vmem:[#allocation2 + $0x58] sm:$0xf] %vm855_vm1, %v791_v26  ;;  %866 = vst.msk [vmem:[#allocation2 + $0x50] sm:$0xf] %vm855_vm1, %v789_v27  ;;  %v1961_v14 = vshll.u32 %v4661_v28, 16  ;;  %v1939_v42 = vrot.slane %v1937_v33, 1 }
  0xa3   : > { %3437 = vmatprep.mubr.msk.bf16.mxu0 %vm1465_vm2, %v1932_v29  ;;  %3831 = vmatprep.subr.bf16.mxu1 %v4180_v1  ;;  %v1953_v52 = vshll.u32 %v4689_v43, 16  ;;  %v1993_v3 = vshll.u32 %v4721_v8, 16  ;;  %v1991_v27 = vor.u32 %v1989_v19, %v1979_v5  ;;  %v4122_v33 = vld [vmem:[%s5082_s3 + $0xf0] sm:$0xff]   ;;  %v2498_v19 = vld [vmem:[#allocation2] sm:$0xee] }
  0xa4   : > { %2302 = vmatmul.mubr.bf16.vlgmr.msra.gmra.mrb[0].mxu0 %v1920_v30  ;;  %v1963_v46 = vrot.slane %v1961_v14, 1  ;;  %v1951_v62 = vor.u32 %v1949_v15, %v1939_v42  ;;  %v4751_v30 = vld [vmem:[#allocation2 + $0x64] ss:$8 sps:$4 sm:$0xff]  }
  0xa5   : > { %1549 = vmatmul.mubr.bf16.gmra.mrb[4].mxu1 %v4644_v58  ;;  %3438 = vmatprep.mubr.msk.bf16.mxu0 %vm1465_vm2, %v1948_v32  ;;  %v795_v37 = vpop.permute.xlu1 %794  ;;  %v793_v38 = vpop.permute.xlu0 %792  ;;  %v1955_v63 = vrot.slane %v1953_v52, 1  ;;  %v4718_v0 = vld [vmem:[#allocation2 + $0x40] ss:$8 sps:$4 sm:$0xff]   ;;  %v1995_v29 = vrot.slane %v1993_v3, 1  ;;  %v3476_v3 = vcombine.high %v2498_v19, %v4636_v51 }
  0xa6   : > { %2857 = vmatpush1.bf16.msra.mxu0 %v4108_v31  ;;  %3359 = vmatprep.mubr.msk.bf16.mxu1 %vm1465_vm2, %v4649_v7  ;;  %869 = vst.msk [vmem:[#allocation2 + $0x68] sm:$0xf] %vm855_vm1, %v795_v37  ;;  %868 = vst.msk [vmem:[#allocation2 + $0x60] sm:$0xf] %vm855_vm1, %v793_v38  ;;  %v1964_v54 = vsel %vm1908_vm3, %v1959_v44, %v1963_v46  ;;  %v1975_v2 = vor.u32 %v1973_v56, %v1963_v46  ;;  %v1969_v17 = vshll.u32 %v4718_v0, 16  ;;  %v4128_v52 = vld [vmem:[%s5082_s3 + $0x100] sm:$0xff]  }
  0xa7   : > { %2858 = vmatprep.subr.bf16.mxu0 %v4180_v1  ;;  %3843 = vmatpush1.bf16.msra.mxu1 %v4306_v39  ;;  %v1940_v39 = vsel %vm1908_vm3, %v1935_v48, %v1939_v42  ;;  %v1956_v13 = vsel %vm1908_vm3, %v1951_v62, %v1955_v63  ;;  %v1996_v37 = vsel %vm1908_vm3, %v1991_v27, %v1995_v29  ;;  %v2005_v38 = vshrl.u32 %v4721_v8, 16 }
  0xa8   : > { %3832 = vmatprep.subr.bf16.mxu1 %v4180_v1  ;;  %v1980_v18 = vsel %vm1908_vm3, %v1975_v2, %v1979_v5  ;;  %v1971_v25 = vrot.slane %v1969_v17, 1  ;;  %v3475_v27 = vcombine.low %v2498_v19, %v4636_v51 }
  0xa9   : > { %v799_v49 = vpop.permute.xlu1 %798  ;;  %v797_v50 = vpop.permute.xlu0 %796  ;;  %v4748_v26 = vld [vmem:[#allocation2 + $0x50] ss:$8 sps:$4 sm:$0xff]  }
  0xaa   : > { %2859 = vmatpush1.bf16.msra.mxu0 %v4109_v40  ;;  %871 = vst.msk [vmem:[#allocation2 + $0x78] sm:$0xf] %vm855_vm1, %v799_v49  ;;  %870 = vst.msk [vmem:[#allocation2 + $0x70] sm:$0xf] %vm855_vm1, %v797_v50  ;;  %v1985_v14 = vshll.u32 %v4748_v26, 16  ;;  %v2009_v40 = vshll.u32 %v4751_v30, 16  ;;  %v2007_v49 = vor.u32 %v2005_v38, %v1995_v29 }
  0xab   : > { %2860 = vmatprep.subr.bf16.mxu0 %v4180_v1  ;;  %3844 = vmatpush1.bf16.msra.mxu1 %v4349_v59  ;;  %v4114_v59 = vld [vmem:[%s5082_s3 + $0xd8] sm:$0xff]  }
  0xac   : > { %2310 = vmatmul.mubr.bf16.gmra.mrb[4].mxu0 %v1940_v39  ;;  %3833 = vmatprep.subr.bf16.mxu1 %v4180_v1  ;;  %v1987_v46 = vrot.slane %v1985_v14, 1  ;;  %v2011_v50 = vrot.slane %v2009_v40, 1  ;;  %v4863_v40 = vld [vmem:[#allocation2 + $0xa4] ss:$8 sps:$4 sm:$0xff]  }
  0xad   : > { %1557 = vmatmul.mubr.bf16.gmra.mrb[8].mxu1 %v4659_v20  ;;  %3439 = vmatprep.mubr.msk.bf16.mxu0 %vm1465_vm2, %v1964_v54  ;;  %v803_v60 = vpop.permute.xlu1 %802  ;;  %v801_v61 = vpop.permute.xlu0 %800  ;;  %v4778_v48 = vld [vmem:[#allocation2 + $0x60] ss:$8 sps:$4 sm:$0xff]  }
  0xae   : > { %3360 = vmatprep.mubr.msk.bf16.mxu1 %vm1465_vm2, %v4661_v28  ;;  %2861 = vmatpush1.bf16.msra.mxu0 %v4112_v4  ;;  %873 = vst.msk [vmem:[#allocation2 + $0x88] sm:$0xf] %vm855_vm1, %v803_v60  ;;  %872 = vst.msk [vmem:[#allocation2 + $0x80] sm:$0xf] %vm855_vm1, %v801_v61  ;;  %v4781_v4 = vld [vmem:[#allocation2 + $0x74] ss:$8 sps:$4 sm:$0xff]   ;;  %v2012_v57 = vsel %vm1908_vm3, %v2007_v49, %v2011_v50 }
  0xaf   : > { %2862 = vmatprep.subr.bf16.mxu0 %v4180_v1  ;;  %3845 = vmatpush1.bf16.msra.mxu1 %v4368_v10  ;;  %v1965_v10 = vshrl.u32 %v4689_v43, 16  ;;  %v2001_v56 = vshll.u32 %v4778_v48, 16  ;;  %v2025_v62 = vshll.u32 %v4781_v4, 16  ;;  %v2013_v17 = vshrl.u32 %v4778_v48, 16 }
  0xb0   : > { %3834 = vmatprep.subr.bf16.mxu1 %v4180_v1 }
  0xb1   : > { %v807_v9 = vpop.permute.xlu1 %806  ;;  %v805_v11 = vpop.permute.xlu0 %804  ;;  %v1967_v24 = vor.u32 %v1965_v10, %v1955_v63  ;;  %v1751_v60 = vld [vmem:[#allocation2 + $0x70] sm:$0xff]  ;;  %v1752_v61 = vld [vmem:[#allocation2 + $0x78] sm:$0xff]  ;;  %v2003_v5 = vrot.slane %v2001_v56, 1  ;;  %v2037_v56 = vshrl.u32 %v4781_v4, 16 }
  0xb2   : > { %2863 = vmatpush1.bf16.msra.mxu0 %v4114_v59  ;;  %875 = vst.msk [vmem:[#allocation2 + $0x98] sm:$0xf] %vm855_vm1, %v807_v9  ;;  %874 = vst.msk [vmem:[#allocation2 + $0x90] sm:$0xf] %vm855_vm1, %v805_v11  ;;  %v2021_v59 = vshrl.u32 %v4751_v30, 16  ;;  %v4807_v9 = vcombine.low %v1751_v60, %v1752_v61 }
  0xb3   : > { %2864 = vmatprep.subr.bf16.mxu0 %v4180_v1  ;;  %3846 = vmatpush1.bf16.msra.mxu1 %v4402_v23  ;;  %v4121_v23 = vld [vmem:[%s5082_s3 + $0xe8] sm:$0xff]   ;;  %v1972_v35 = vsel %vm1908_vm3, %v1967_v24, %v1971_v25  ;;  %v2674_v24 = vrot.slane %v4638_v55, 1  ;;  %v2671_v55 = vrot.slane %v4644_v58, 1  ;;  %v2676_v58 = vrot.slane %v4659_v20, 1 }
  0xb4   : > { %2318 = vmatmul.mubr.bf16.gmra.mrb[8].mxu0 %v1956_v13  ;;  %3835 = vmatprep.subr.bf16.mxu1 %v4180_v1  ;;  %v2023_v11 = vor.u32 %v2021_v59, %v2011_v50  ;;  %v4132_v13 = vld [vmem:[%s5082_s3 + $0x110] sm:$0xff]   ;;  %v2680_v20 = vrot.slane %v4689_v43, 1 }
  0xb5   : > { %1565 = vmatmul.mubr.bf16.gmra.mrb[12].mxu1 %v4689_v43  ;;  %3440 = vmatprep.mubr.msk.bf16.mxu0 %vm1465_vm2, %v1980_v18  ;;  %v811_v21 = vpop.permute.xlu1 %810  ;;  %v809_v22 = vpop.permute.xlu0 %808  ;;  %v2017_v18 = vshll.u32 %v4807_v9, 16  ;;  %v4848_v51 = vld [vmem:[#allocation2 + $0x80] ss:$8 sps:$4 sm:$0xff]   ;;  %v2677_v14 = vsel %vm2669_vm4, %v2671_v55, %v2676_v58  ;;  %v2684_v43 = vrot.slane %v4718_v0, 1 }
  0xb6   : > { %3361 = vmatprep.mubr.msk.bf16.mxu1 %vm1465_vm2, %v4691_v47  ;;  %2865 = vmatpush1.bf16.msra.mxu0 %v4117_v12  ;;  %877 = vst.msk [vmem:[#allocation2 + $0xa8] sm:$0xf] %vm855_vm1, %v811_v21  ;;  %876 = vst.msk [vmem:[#allocation2 + $0xa0] sm:$0xf] %vm855_vm1, %v809_v22  ;;  %v4810_v12 = vrot.slane %v2025_v62, 1  ;;  %v4133_v21 = vld [vmem:[%s5082_s3 + $0x118] sm:$0xff]   ;;  %v2015_v22 = vor.u32 %v2013_v17, %v2003_v5 }
  0xb7   : > { %2866 = vmatprep.subr.bf16.mxu0 %v4180_v1  ;;  %3847 = vmatpush1.bf16.msra.mxu1 %v4426_v34  ;;  %v1981_v34 = vshrl.u32 %v4718_v0, 16 }
  0xb8   : > { %3836 = vmatprep.subr.bf16.mxu1 %v4180_v1  ;;  %v2039_v60 = vor.u32 %v2037_v56, %v4810_v12 }
  0xb9   : > { %v815_v31 = vpop.permute.xlu1 %814  ;;  %v813_v32 = vpop.permute.xlu0 %812  ;;  %v1983_v44 = vor.u32 %v1981_v34, %v1971_v25  ;;  %v4851_v34 = vld [vmem:[#allocation2 + $0x94] ss:$8 sps:$4 sm:$0xff]  }
  0xba   : > { %2867 = vmatpush1.bf16.msra.mxu0 %v4121_v23  ;;  %879 = vst.msk [vmem:[#allocation2 + $0xb8] sm:$0xf] %vm855_vm1, %v815_v31  ;;  %878 = vst.msk [vmem:[#allocation2 + $0xb0] sm:$0xf] %vm855_vm1, %v813_v32  ;;  %v2673_v23 = vrot.slane %v3476_v3, 1  ;;  %v2678_v32 = vrot.slane %v4649_v7, 1 }
  0xbb   : > { %2868 = vmatprep.subr.bf16.mxu0 %v4180_v1  ;;  %3848 = vmatpush1.bf16.msra.mxu1 %v4440_v45  ;;  %v4126_v45 = vld [vmem:[%s5082_s3 + $0xf8] sm:$0xff]   ;;  %v1988_v54 = vsel %vm1908_vm3, %v1983_v44, %v1987_v46  ;;  %v4839_v31 = vld [vmem:[#allocation2 + $0x84] ss:$8 sps:$4 sm:$0xff]   ;;  %v2682_v7 = vrot.slane %v4661_v28, 1  ;;  %v2686_v28 = vrot.slane %v4691_v47, 1  ;;  %v2690_v47 = vrot.slane %v4721_v8, 1 }
  0xbc   : > { %2326 = vmatmul.mubr.bf16.gmra.mrb[12].mxu0 %v1972_v35  ;;  %3837 = vmatprep.subr.bf16.mxu1 %v4180_v1  ;;  %v2675_v29 = vsel %vm2669_vm4, %v2673_v23, %v2674_v24  ;;  %v2679_v35 = vsel %vm2669_vm4, %v2674_v24, %v2678_v32  ;;  %v4875_v44 = vld [vmem:[#allocation2 + $0xb4] ss:$8 sps:$4 sm:$0xff]   ;;  %v2073_v23 = vshll.u32 %v4863_v40, 16  ;;  %v2700_v24 = vrot.slane %v4848_v51, 1 }
  0xbd   : > { %1573 = vmatmul.mubr.bf16.gmra.mrb[16].mxu1 %v4718_v0  ;;  %3441 = vmatprep.mubr.msk.bf16.mxu0 %vm1465_vm2, %v1996_v37  ;;  %v819_v41 = vpop.permute.xlu1 %818  ;;  %v817_v42 = vpop.permute.xlu0 %816  ;;  %v4860_v37 = vld [vmem:[#allocation2 + $0x90] ss:$8 sps:$4 sm:$0xff]   ;;  %v2683_v38 = vsel %vm2669_vm4, %v2678_v32, %v2682_v7  ;;  %v2691_v50 = vsel %vm2669_vm4, %v2686_v28, %v2690_v47  ;;  %v2688_v0 = vrot.slane %v4748_v26, 1 }
  0xbe   : > { %3362 = vmatprep.mubr.msk.bf16.mxu1 %vm1465_vm2, %v4721_v8  ;;  %2869 = vmatpush1.bf16.msra.mxu0 %v4122_v33  ;;  %881 = vst.msk [vmem:[#allocation2 + $0xc8] sm:$0xf] %vm855_vm1, %v819_v41  ;;  %880 = vst.msk [vmem:[#allocation2 + $0xc0] sm:$0xf] %vm855_vm1, %v817_v42  ;;  %v2681_v41 = vsel %vm2669_vm4, %v2676_v58, %v2680_v20  ;;  %v4872_v42 = vld [vmem:[#allocation2 + $0xa0] ss:$8 sps:$4 sm:$0xff]  }
  0xbf   : > { %2870 = vmatprep.subr.bf16.mxu0 %v4180_v1  ;;  %3849 = vmatpush1.bf16.msra.mxu1 %v4480_v16  ;;  %v1997_v16 = vshrl.u32 %v4748_v26, 16  ;;  %v2694_v8 = vrot.slane %v4751_v30, 1  ;;  %v2065_v58 = vshll.u32 %v4872_v42, 16 }
  0xc0   : > { %3838 = vmatprep.subr.bf16.mxu1 %v4180_v1 }
  0xc1   : > { %v823_v39 = vpop.permute.xlu1 %822  ;;  %v821_v15 = vpop.permute.xlu0 %820  ;;  %v1999_v2 = vor.u32 %v1997_v16, %v1987_v46  ;;  %v2685_v46 = vsel %vm2669_vm4, %v2680_v20, %v2684_v43  ;;  %v4884_v49 = vld [vmem:[#allocation2 + $0xb0] ss:$8 sps:$4 sm:$0xff]   ;;  %v4899_v16 = vld [vmem:[#allocation2 + $0xd4] ss:$8 sps:$4 sm:$0xff]   ;;  %v2067_v20 = vrot.slane %v2065_v58, 1 }
  0xc2   : > { %2871 = vmatpush1.bf16.msra.mxu0 %v4126_v45  ;;  %883 = vst.msk [vmem:[#allocation2 + $0xd8] sm:$0xf] %vm855_vm1, %v823_v39  ;;  %882 = vst.msk [vmem:[#allocation2 + $0xd0] sm:$0xf] %vm855_vm1, %v821_v15  ;;  %v2687_v45 = vsel %vm2669_vm4, %v2682_v7, %v2686_v28  ;;  %v4887_v39 = vld [vmem:[#allocation2 + $0xc4] ss:$8 sps:$4 sm:$0xff]   ;;  %v2689_v15 = vsel %vm2669_vm4, %v2684_v43, %v2688_v0 }
  0xc3   : > { %2872 = vmatprep.subr.bf16.mxu0 %v4180_v1  ;;  %3850 = vmatpush1.bf16.msra.mxu1 %v4507_v36  ;;  %v4131_v36 = vld [vmem:[%s5082_s3 + $0x108] sm:$0xff]   ;;  %v2004_v10 = vsel %vm1908_vm3, %v1999_v2, %v2003_v5  ;;  %v2033_v2 = vshll.u32 %v4848_v51, 16  ;;  %v2057_v5 = vshll.u32 %v4851_v34, 16  ;;  %v2089_v7 = vshll.u32 %v4875_v44, 16 }
  0xc4   : > { %2334 = vmatmul.mubr.bf16.gmra.mrb[16].mxu0 %v1988_v54  ;;  %3839 = vmatprep.subr.bf16.mxu1 %v4180_v1  ;;  %v2695_v54 = vsel %vm2669_vm4, %v2690_v47, %v2694_v8  ;;  %v2710_v28 = vrot.slane %v4863_v40, 1 }
  0xc5   : > { %1581 = vmatmul.mubr.bf16.gmra.mrb[20].mxu1 %v4748_v26  ;;  %3442 = vmatprep.mubr.msk.bf16.mxu0 %vm1465_vm2, %v2012_v57  ;;  %v825_v63 = vpop.permute.xlu0 %824  ;;  %v2041_v57 = vshll.u32 %v4839_v31, 16  ;;  %v2692_v26 = vrot.slane %v4778_v48, 1 }
  0xc6   : > { %3363 = vmatprep.mubr.msk.bf16.mxu1 %vm1465_vm2, %v4751_v30  ;;  %2873 = vmatpush1.bf16.msra.mxu0 %v4128_v52  ;;  %884 = vst.msk [vmem:[#allocation2 + $0xe0] sm:$0xf] %vm855_vm1, %v825_v63  ;;  %v4896_v52 = vld [vmem:[#allocation2 + $0xc0] ss:$8 sps:$4 sm:$0xff]   ;;  %v2698_v30 = vrot.slane %v4781_v4, 1  ;;  %v2029_v63 = vshrl.u32 %v4807_v9, 16 }
  0xc7   : > { %2874 = vmatprep.subr.bf16.mxu0 %v4180_v1  ;;  %3851 = vmatpush1.bf16.msra.mxu1 %v4532_v53  ;;  %v2028_v53 = vsel %vm1908_vm3, %v2023_v11, %v4810_v12  ;;  %v2043_v61 = vrot.slane %v2041_v57, 1  ;;  %v2693_v59 = vsel %vm2669_vm4, %v2688_v0, %v2692_v26  ;;  %v2696_v11 = vrot.slane %v4807_v9, 1 }
  0xc8   : > { %3840 = vmatprep.subr.bf16.mxu1 %v4180_v1  ;;  %v2081_v0 = vshll.u32 %v4884_v49, 16  ;;  %v2714_v57 = vrot.slane %v4875_v44, 1 }
  0xc9   : > { %v4911_v62 = vld [vmem:[#allocation2 + $0xd0] ss:$8 sps:$4 sm:$0xff]   ;;  %v2697_v19 = vsel %vm2669_vm4, %v2692_v26, %v2696_v11 }
  0xca   : > { %2875 = vmatpush1.bf16.msra.mxu0 %v4131_v36  ;;  %v2699_v36 = vsel %vm2669_vm4, %v2694_v8, %v2698_v30  ;;  %v2105_v8 = vshll.u32 %v4887_v39, 16  ;;  %v2083_v56 = vrot.slane %v2081_v0, 1 }
  0xcb   : > { %2876 = vmatprep.subr.bf16.mxu0 %v4180_v1  ;;  %3852 = vmatpush1.bf16.msra.mxu1 %v4549_v6  ;;  %v4831_v6 = vrot.slane %v2017_v18, 1  ;;  %v2059_v18 = vrot.slane %v2057_v5, 1 }
  0xcc   : > { %2342 = vmatmul.mubr.bf16.gmra.mrb[20].mxu0 %v2004_v10  ;;  %v2702_v10 = vrot.slane %v4839_v31, 1 }
  0xcd   : > { %1589 = vmatmul.mubr.bf16.gmra.mrb[24].mxu1 %v4778_v48  ;;  %3443 = vmatprep.mubr.msk.bf16.mxu0 %vm1465_vm2, %v2028_v53  ;;  %v2020_v25 = vsel %vm1908_vm3, %v2015_v22, %v4831_v6  ;;  %v2044_v48 = vsel %vm1908_vm3, %v2039_v60, %v2043_v61  ;;  %v2031_v12 = vor.u32 %v2029_v63, %v4831_v6  ;;  %v2049_v22 = vshll.u32 %v4860_v37, 16 }
  0xce   : > { %3364 = vmatprep.mubr.msk.bf16.mxu1 %vm1465_vm2, %v4781_v4  ;;  %2877 = vmatpush1.bf16.msra.mxu0 %v4132_v13  ;;  %v2053_v4 = vshrl.u32 %v4839_v31, 16  ;;  %v2035_v13 = vrot.slane %v2033_v2, 1  ;;  %v2703_v3 = vsel %vm2669_vm4, %v2698_v30, %v2702_v10  ;;  %v2069_v6 = vshrl.u32 %v4851_v34, 16 }
  0xcf   : > { %2878 = vmatprep.subr.bf16.mxu0 %v4180_v1  ;;  %v2670_v1 = vrot.slane %v3475_v27, 1  ;;  %v2051_v27 = vrot.slane %v2049_v22, 1  ;;  %v2107_v30 = vrot.slane %v2105_v8, 1  ;;  %v2093_v63 = vshrl.u32 %v4884_v49, 16 }
  0xd0   : > { %v2055_v17 = vor.u32 %v2053_v4, %v2043_v61  ;;  %v2036_v53 = vsel %vm1908_vm3, %v2031_v12, %v2035_v13  ;;  %v2121_v2 = vshll.u32 %v4899_v16, 16  ;;  %v2712_v4 = vrot.slane %v4884_v49, 1 }
  0xd1   : > { %v2672_v33 = vsel %vm2669_vm4, %v2670_v1, %v2671_v55  ;;  %v2075_v1 = vrot.slane %v2073_v23, 1  ;;  %v2701_v55 = vsel %vm2669_vm4, %v2696_v11, %v2700_v24  ;;  %v2095_v5 = vor.u32 %v2093_v63, %v2083_v56 }
  0xd2   : > { %2879 = vmatpush1.bf16.msra.mxu0 %v4133_v21  ;;  %v2045_v21 = vshrl.u32 %v4848_v51, 16  ;;  %v2718_v12 = vrot.slane %v4887_v39, 1 }
  0xd4   : > { %2350 = vmatmul.mubr.bf16.gmra.mrb[24].mxu0 %v2020_v25  ;;  %v2047_v25 = vor.u32 %v2045_v21, %v2035_v13  ;;  %v2113_v21 = vshll.u32 %v4911_v62, 16 }
  0xd5   : > { %1597 = vmatmul.mubr.bf16.gmra.mrb[28].mxu1 %v4807_v9  ;;  %3517 = vmatprep.mubr.msk.bf16.mxu0 %vm1465_vm2, %v2675_v29  ;;  %v2060_v9 = vsel %vm1908_vm3, %v2055_v17, %v2059_v18  ;;  %v2706_v29 = vrot.slane %v4851_v34, 1 }
  0xd6   : > { %3365 = vmatprep.mubr.msk.bf16.mxu1 %vm1465_vm2, %v4839_v31  ;;  %v2071_v31 = vor.u32 %v2069_v6, %v2059_v18  ;;  %v2052_v32 = vsel %vm1908_vm3, %v2047_v25, %v2051_v27  ;;  %v2722_v6 = vrot.slane %v4899_v16, 1 }
  0xdc   : > { %2889 = vmatmul.mubr.bf16.vlgmr.msra.gmra.mrb[0].mxu0 %v2672_v33  ;;  %v2707_v33 = vsel %vm2669_vm4, %v2702_v10, %v2706_v29  ;;  %v2123_v10 = vrot.slane %v2121_v2, 1 }
  0xdd   : > { %1605 = vmatmul.mubr.bf16.gmra.mrb[32].mxu1 %v4848_v51  ;;  %3518 = vmatprep.mubr.msk.bf16.mxu0 %vm1465_vm2, %v2679_v35  ;;  %v2061_v35 = vshrl.u32 %v4860_v37, 16  ;;  %v2076_v51 = vsel %vm1908_vm3, %v2071_v31, %v2075_v1  ;;  %v2526_v31 = vld [vmem:[#allocation2 + $0xe0] sm:$0x11] }
  0xde   : > { %3366 = vmatprep.mubr.msk.bf16.mxu1 %vm1465_vm2, %v4851_v34  ;;  %v2085_v34 = vshrl.u32 %v4863_v40, 16  ;;  %v3504_v58 = vcombine.high %v2526_v31, %v2526_v31 }
  0xe4   : > { %2897 = vmatmul.mubr.bf16.gmra.mrb[4].mxu0 %v2677_v14  ;;  %v2704_v14 = vrot.slane %v4860_v37, 1 }
  0xe5   : > { %1613 = vmatmul.mubr.bf16.gmra.mrb[36].mxu1 %v4860_v37  ;;  %3519 = vmatprep.mubr.msk.bf16.mxu0 %vm1465_vm2, %v2683_v38  ;;  %v2063_v38 = vor.u32 %v2061_v35, %v2051_v27 }
  0xe6   : > { %3367 = vmatprep.mubr.msk.bf16.mxu1 %vm1465_vm2, %v4863_v40  ;;  %v2705_v43 = vsel %vm2669_vm4, %v2700_v24, %v2704_v14  ;;  %v2101_v40 = vshrl.u32 %v4875_v44, 16  ;;  %v2115_v24 = vrot.slane %v2113_v21, 1 }
  0xe7   : > { %v2068_v47 = vsel %vm1908_vm3, %v2063_v38, %v2067_v20  ;;  %v3503_v38 = vcombine.low %v2526_v31, %v2526_v31 }
  0xec   : > { %2905 = vmatmul.mubr.bf16.gmra.mrb[8].mxu0 %v2681_v41  ;;  %v2087_v41 = vor.u32 %v2085_v34, %v2075_v1 }
  0xed   : > { %1621 = vmatmul.mubr.bf16.gmra.mrb[40].mxu1 %v4872_v42  ;;  %3520 = vmatprep.mubr.msk.bf16.mxu0 %vm1465_vm2, %v2687_v45  ;;  %v2091_v45 = vrot.slane %v2089_v7, 1  ;;  %v2726_v7 = vrot.slane %v3504_v58, 1 }
  0xee   : > { %3368 = vmatprep.mubr.msk.bf16.mxu1 %vm1465_vm2, %v4875_v44  ;;  %v2117_v44 = vshrl.u32 %v4887_v39, 16 }
  0xef   : > { %v2092_v37 = vsel %vm1908_vm3, %v2087_v41, %v2091_v45  ;;  %v2103_v26 = vor.u32 %v2101_v40, %v2091_v45  ;;  %v2724_v41 = vrot.slane %v3503_v38, 1 }
  0xf0   : > { %v2119_v13 = vor.u32 %v2117_v44, %v2107_v30 }
  0xf4   : > { %2913 = vmatmul.mubr.bf16.gmra.mrb[12].mxu0 %v2685_v46  ;;  %v2711_v46 = vsel %vm2669_vm4, %v2706_v29, %v2710_v28 }
  0xf5   : > { %1629 = vmatmul.mubr.bf16.gmra.mrb[44].mxu1 %v4884_v49  ;;  %3521 = vmatprep.mubr.msk.bf16.mxu0 %vm1465_vm2, %v2691_v50  ;;  %v2077_v50 = vshrl.u32 %v4872_v42, 16  ;;  %v2124_v49 = vsel %vm1908_vm3, %v2119_v13, %v2123_v10  ;;  %v5005_v13 = vld [vmem:[%s5083_s4] ss:$0 sm:$0xff] }
  0xf6   : > { %3369 = vmatprep.mubr.msk.bf16.mxu1 %vm1465_vm2, %v4887_v39  ;;  %v2133_v39 = vshrl.u32 %v4899_v16, 16 }
  0xf8   : > { %v2135_v27 = vor.u32 %v2133_v39, %v2123_v10 }
  0xfc   : > { %2921 = vmatmul.mubr.bf16.gmra.mrb[16].mxu0 %v2689_v15  ;;  %v2708_v15 = vrot.slane %v4872_v42, 1  ;;  %v2108_v42 = vsel %vm1908_vm3, %v2103_v26, %v2107_v30 }
  0xfd   : > { %1637 = vmatmul.mubr.bf16.gmra.mrb[48].mxu1 %v4896_v52  ;;  %3522 = vmatprep.mubr.msk.bf16.mxu0 %vm1465_vm2, %v2695_v54  ;;  %v2079_v54 = vor.u32 %v2077_v50, %v2067_v20 }
  0xfe   : > { %3370 = vmatprep.mubr.msk.bf16.mxu1 %vm1465_vm2, %v4899_v16  ;;  %v2709_v60 = vsel %vm2669_vm4, %v2704_v14, %v2708_v15  ;;  %v2713_v18 = vsel %vm2669_vm4, %v2708_v15, %v2712_v4  ;;  %v2720_v16 = vrot.slane %v4911_v62, 1 }
  0xff   : > { %v2084_v61 = vsel %vm1908_vm3, %v2079_v54, %v2083_v56 }
 0x100   : > { %v2725_v45 = vsel %vm2669_vm4, %v2720_v16, %v2724_v41 }
 0x104   : > { %2929 = vmatmul.mubr.bf16.gmra.mrb[20].mxu0 %v2693_v59  ;;  %v2715_v59 = vsel %vm2669_vm4, %v2710_v28, %v2714_v57  ;;  %v2727_v28 = vsel %vm2669_vm4, %v2722_v6, %v2726_v7 }
 0x105   : > { %1645 = vmatmul.mubr.bf16.gmra.mrb[52].mxu1 %v4911_v62  ;;  %3523 = vmatprep.mubr.msk.bf16.mxu0 %vm1465_vm2, %v2699_v36  ;;  %v2097_v36 = vshll.u32 %v4896_v52, 16 }
 0x106   : > { %3444 = vmatprep.mubr.msk.bf16.mxu1 %vm1465_vm2, %v2044_v48  ;;  %v1765_v48 = vld [vmem:[#allocation2 + $0xe0] sm:$0x11] }
 0x107   : > { %v2099_v11 = vrot.slane %v2097_v36, 1  ;;  %v3424_v17 = vcombine.high %v1765_v48, %v1765_v48  ;;  %v3423_v25 = vcombine.low %v1765_v48, %v1765_v48 }
 0x109   : > { %v2137_v22 = vshll.u32 %v3424_v17, 16  ;;  %v2129_v35 = vshll.u32 %v3423_v25, 16 }
 0x10b   : > { %v2139_v29 = vrot.slane %v2137_v22, 1  ;;  %v2131_v34 = vrot.slane %v2129_v35, 1 }
 0x10c   : > { %2937 = vmatmul.mubr.bf16.gmra.mrb[24].mxu0 %v2697_v19  ;;  %v2100_v19 = vsel %vm1908_vm3, %v2095_v5, %v2099_v11 }
 0x10d   : > { %2358 = vmatmul.mubr.bf16.vlgmr.msra.gmra.mrb[28].mxu1 %v2036_v53  ;;  %3524 = vmatprep.mubr.msk.bf16.mxu0 %vm1465_vm2, %v2703_v3  ;;  %v2719_v53 = vsel %vm2669_vm4, %v2714_v57, %v2718_v12  ;;  %v2109_v3 = vshrl.u32 %v4896_v52, 16 }
 0x10e   : > { %3445 = vmatprep.mubr.msk.bf16.mxu1 %vm1465_vm2, %v2060_v9  ;;  %v2716_v9 = vrot.slane %v4896_v52, 1  ;;  %v2140_v52 = vsel %vm1908_vm3, %v2135_v27, %v2139_v29 }
 0x10f   : > { %v2111_v23 = vor.u32 %v2109_v3, %v2099_v11 }
 0x110   : > { %v2717_v1 = vsel %vm2669_vm4, %v2712_v4, %v2716_v9  ;;  %v2721_v14 = vsel %vm2669_vm4, %v2716_v9, %v2720_v16 }
 0x114   : > { %2945 = vmatmul.mubr.bf16.gmra.mrb[28].mxu0 %v2701_v55  ;;  %v2723_v55 = vsel %vm2669_vm4, %v2718_v12, %v2722_v6 }
 0x115   : > { %2366 = vmatmul.mubr.bf16.gmra.mrb[32].mxu1 %v2052_v32  ;;  %3525 = vmatprep.mubr.msk.bf16.mxu0 %vm1465_vm2, %v2707_v33  ;;  %v2116_v32 = vsel %vm1908_vm3, %v2111_v23, %v2115_v24  ;;  %v2125_v33 = vshrl.u32 %v4911_v62, 16 }
 0x116   : > { %3446 = vmatprep.mubr.msk.bf16.mxu1 %vm1465_vm2, %v2076_v51 }
 0x117   : > { %v2127_v51 = vor.u32 %v2125_v33, %v2115_v24 }
 0x119   : > { %v2132_v20 = vsel %vm1908_vm3, %v2127_v51, %v2131_v34 }
 0x11c   : > { %2953 = vmatmul.mubr.bf16.gmra.mrb[32].mxu0 %v2705_v43 }
 0x11d   : > { %2374 = vmatmul.mubr.bf16.gmra.mrb[36].mxu1 %v2068_v47  ;;  %3526 = vmatprep.mubr.msk.bf16.mxu0 %vm1465_vm2, %v2711_v46 }
 0x11e   : > { %3447 = vmatprep.mubr.msk.bf16.mxu1 %vm1465_vm2, %v2092_v37 }
 0x124   : > { %2961 = vmatmul.mubr.bf16.gmra.mrb[36].mxu0 %v2709_v60 }
 0x125   : > { %2382 = vmatmul.mubr.bf16.gmra.mrb[40].mxu1 %v2084_v61  ;;  %3527 = vmatprep.mubr.msk.bf16.mxu0 %vm1465_vm2, %v2715_v59 }
 0x126   : > { %3448 = vmatprep.mubr.msk.bf16.mxu1 %vm1465_vm2, %v2108_v42 }
 0x12c   : > { %2969 = vmatmul.mubr.bf16.gmra.mrb[40].mxu0 %v2713_v18 }
 0x12d   : > { %2390 = vmatmul.mubr.bf16.gmra.mrb[44].mxu1 %v2100_v19  ;;  %3528 = vmatprep.mubr.msk.bf16.mxu0 %vm1465_vm2, %v2719_v53 }
 0x12e   : > { %3449 = vmatprep.mubr.msk.bf16.mxu1 %vm1465_vm2, %v2124_v49 }
 0x134   : > { %2977 = vmatmul.mubr.bf16.gmra.mrb[44].mxu0 %v2717_v1 }
 0x135   : > { %2398 = vmatmul.mubr.bf16.gmra.mrb[48].mxu1 %v2116_v32  ;;  %3529 = vmatprep.mubr.msk.bf16.mxu0 %vm1465_vm2, %v2723_v55 }
 0x136   : > { %3450 = vmatprep.mubr.msk.bf16.mxu1 %vm1465_vm2, %v2140_v52 }
 0x13c   : > { %2985 = vmatmul.mubr.bf16.gmra.mrb[48].mxu0 %v2721_v14 }
 0x13d   : > { %2406 = vmatmul.mubr.bf16.gmra.mrb[52].mxu1 %v2132_v20  ;;  %3530 = vmatprep.mubr.msk.bf16.mxu0 %vm1465_vm2, %v2727_v28 }
 0x144   : > { %2993 = vmatmul.mubr.bf16.gmra.mrb[52].mxu0 %v2725_v45 }
 0x170   : > { %v1542_v43 = vpop.f32.mrb[0].mxu1 }
 0x171   : > { %v1544_v62 = vpop.f32.mrb[1].mxu1  ;;  %v1653_v10 = vadd.f32 %v5005_v13, %v1542_v43 }
 0x172   : > { %v1545_v47 = vpop.f32.mrb[2].mxu1 }
 0x173   : > { %v1547_v46 = vpop.f32.mrb[3].mxu1  ;;  %v1654_v18 = vadd.f32 %v5005_v13, %v1545_v47 }
 0x178   : > { %v1550_v50 = vpop.f32.mrb[4].mxu1 }
 0x179   : > { %v1552_v0 = vpop.f32.mrb[5].mxu1  ;;  %v1655_v39 = vadd.f32 %v5005_v13, %v1550_v50 }
 0x17a   : > { %v1553_v37 = vpop.f32.mrb[6].mxu1 }
 0x17b   : > { %v1555_v40 = vpop.f32.mrb[7].mxu1  ;;  %v1656_v9 = vadd.f32 %v5005_v13, %v1553_v37 }
 0x180   : > { %v1558_v8 = vpop.f32.mrb[8].mxu1 }
 0x181   : > { %v1560_v15 = vpop.f32.mrb[9].mxu1  ;;  %v1657_v29 = vadd.f32 %v5005_v13, %v1558_v8 }
 0x182   : > { %v1561_v54 = vpop.f32.mrb[10].mxu1 }
 0x183   : > { %v1563_v56 = vpop.f32.mrb[11].mxu1  ;;  %v1658_v1 = vadd.f32 %v5005_v13, %v1561_v54 }
 0x188   : > { %v1566_v57 = vpop.f32.mrb[12].mxu1 }
 0x189   : > { %v1568_v26 = vpop.f32.mrb[13].mxu1  ;;  %v1659_v52 = vadd.f32 %v5005_v13, %v1566_v57 }
 0x18a   : > { %v1569_v30 = vpop.f32.mrb[14].mxu1 }
 0x18b   : > { %v1571_v60 = vpop.f32.mrb[15].mxu1  ;;  %v1660_v51 = vadd.f32 %v5005_v13, %v1569_v30 }
 0x190   : > { %v1574_v61 = vpop.f32.mrb[16].mxu1 }
 0x191   : > { %v1576_v59 = vpop.f32.mrb[17].mxu1  ;;  %v1661_v28 = vadd.f32 %v5005_v13, %v1574_v61 }
 0x192   : > { %v1577_v63 = vpop.f32.mrb[18].mxu1 }
 0x193   : > { %v1579_v36 = vpop.f32.mrb[19].mxu1  ;;  %v1662_v45 = vadd.f32 %v5005_v13, %v1577_v63 }
 0x198   : > { %v1582_v42 = vpop.f32.mrb[20].mxu1 }
 0x199   : > { %v1584_v44 = vpop.f32.mrb[21].mxu1  ;;  %v1663_v0 = vadd.f32 %v5005_v13, %v1582_v42 }
 0x19a   : > { %v1585_v2 = vpop.f32.mrb[22].mxu1 }
 0x19b   : > { %v1587_v48 = vpop.f32.mrb[23].mxu1  ;;  %v1664_v40 = vadd.f32 %v5005_v13, %v1585_v2 }
 0x1a0   : > { %v4997_v4 = vpop.f32.mrb[24].mxu1 }
 0x1a1   : > { %v1592_v5 = vpop.f32.mrb[25].mxu1  ;;  %v1665_v26 = vadd.f32 %v5005_v13, %v4997_v4 }
 0x1a2   : > { %v4999_v11 = vpop.f32.mrb[26].mxu1 }
 0x1a3   : > { %v1595_v12 = vpop.f32.mrb[27].mxu1  ;;  %v1666_v60 = vadd.f32 %v5005_v13, %v4999_v11 }
 0x1af   : > { %v2890_v17 = vpop.f32.mrb[0].mxu0 }
 0x1b0   : > { %v3856_v19 = vadd.f32 %v2890_v17, %v1653_v10  ;;  %v2892_v53 = vpop.f32.mrb[1].mxu0 }
 0x1b1   : > { %v2893_v3 = vpop.f32.mrb[2].mxu0 }
 0x1b2   : > { %3029 = vst [vmem:[%s5011_s28] sm:$0xff] %v3856_v19  ;;  %v3860_v21 = vadd.f32 %v2893_v3, %v1654_v18  ;;  %v2895_v49 = vpop.f32.mrb[3].mxu0 }
 0x1b4   : > { %3030 = vst [vmem:[%s5011_s28 + $0x8] sm:$0xff] %v3860_v21 }
 0x1b7   : > { %v2898_v22 = vpop.f32.mrb[4].mxu0 }
 0x1b8   : > { %v3864_v6 = vadd.f32 %v2898_v22, %v1655_v39  ;;  %v2900_v23 = vpop.f32.mrb[5].mxu0 }
 0x1b9   : > { %v2901_v24 = vpop.f32.mrb[6].mxu0 }
 0x1ba   : > { %3031 = vst [vmem:[%s5011_s28 + $0x10] sm:$0xff] %v3864_v6  ;;  %v3868_v25 = vadd.f32 %v2901_v24, %v1656_v9  ;;  %v2903_v27 = vpop.f32.mrb[7].mxu0 }
 0x1bc   : > { %3032 = vst [vmem:[%s5011_s28 + $0x18] sm:$0xff] %v3868_v25 }
 0x1bf   : > { %v2906_v31 = vpop.f32.mrb[8].mxu0 }
 0x1c0   : > { %v3872_v55 = vadd.f32 %v2906_v31, %v1657_v29  ;;  %v2908_v32 = vpop.f32.mrb[9].mxu0 }
 0x1c1   : > { %v2909_v33 = vpop.f32.mrb[10].mxu0 }
 0x1c2   : > { %3033 = vst [vmem:[%s5011_s28 + $0x20] sm:$0xff] %v3872_v55  ;;  %v3876_v35 = vadd.f32 %v2909_v33, %v1658_v1  ;;  %v2911_v58 = vpop.f32.mrb[11].mxu0 }
 0x1c4   : > { %3034 = vst [vmem:[%s5011_s28 + $0x28] sm:$0xff] %v3876_v35 }
 0x1c7   : > { %v2914_v16 = vpop.f32.mrb[12].mxu0 }
 0x1c8   : > { %v3880_v34 = vadd.f32 %v2914_v16, %v1659_v52  ;;  %v2916_v7 = vpop.f32.mrb[13].mxu0 }
 0x1c9   : > { %v2917_v14 = vpop.f32.mrb[14].mxu0 }
 0x1ca   : > { %3035 = vst [vmem:[%s5011_s28 + $0x30] sm:$0xff] %v3880_v34  ;;  %v3884_v38 = vadd.f32 %v2917_v14, %v1660_v51  ;;  %v2919_v20 = vpop.f32.mrb[15].mxu0 }
 0x1cc   : > { %3036 = vst [vmem:[%s5011_s28 + $0x38] sm:$0xff] %v3884_v38 }
 0x1cf   : > { %v2922_v41 = vpop.f32.mrb[16].mxu0 }
 0x1d0   : > { %v3888_v43 = vadd.f32 %v2922_v41, %v1661_v28  ;;  %v2924_v62 = vpop.f32.mrb[17].mxu0 }
 0x1d1   : > { %v2925_v47 = vpop.f32.mrb[18].mxu0 }
 0x1d2   : > { %3037 = vst [vmem:[%s5011_s28 + $0x40] sm:$0xff] %v3888_v43  ;;  %v3892_v46 = vadd.f32 %v2925_v47, %v1662_v45  ;;  %v2927_v50 = vpop.f32.mrb[19].mxu0 }
 0x1d4   : > { %3038 = vst [vmem:[%s5011_s28 + $0x48] sm:$0xff] %v3892_v46 }
 0x1d7   : > { %v2930_v37 = vpop.f32.mrb[20].mxu0 }
 0x1d8   : > { %v3896_v8 = vadd.f32 %v2930_v37, %v1663_v0  ;;  %v2932_v15 = vpop.f32.mrb[21].mxu0 }
 0x1d9   : > { %v2933_v54 = vpop.f32.mrb[22].mxu0 }
 0x1da   : > { %3039 = vst [vmem:[%s5011_s28 + $0x50] sm:$0xff] %v3896_v8  ;;  %v3900_v56 = vadd.f32 %v2933_v54, %v1664_v40  ;;  %v2935_v57 = vpop.f32.mrb[23].mxu0 }
 0x1dc   : > { %3040 = vst [vmem:[%s5011_s28 + $0x58] sm:$0xff] %v3900_v56 }
 0x1df   : > { %v2938_v30 = vpop.f32.mrb[24].mxu0 }
 0x1e0   : > { %v3904_v61 = vadd.f32 %v2938_v30, %v1665_v26  ;;  %v2359_v59 = vpop.f32.mrb[28].mxu1  ;;  %v2940_v63 = vpop.f32.mrb[25].mxu0 }
 0x1e1   : > { %v2361_v36 = vpop.f32.mrb[29].mxu1  ;;  %v2941_v42 = vpop.f32.mrb[26].mxu0  ;;  %v3911_v12 = vadd.f32 %v5005_v13, %v2359_v59 }
 0x1e2   : > { %3041 = vst [vmem:[%s5011_s28 + $0x60] sm:$0xff] %v3904_v61  ;;  %v3908_v44 = vadd.f32 %v2941_v42, %v1666_v60  ;;  %v2362_v2 = vpop.f32.mrb[30].mxu1  ;;  %v2943_v48 = vpop.f32.mrb[27].mxu0 }
 0x1e3   : > { %v2364_v5 = vpop.f32.mrb[31].mxu1  ;;  %v3917_v10 = vadd.f32 %v5005_v13, %v2362_v2 }
 0x1e4   : > { %3042 = vst [vmem:[%s5011_s28 + $0x68] sm:$0xff] %v3908_v44 }
 0x1e7   : > { %v2946_v4 = vpop.f32.mrb[28].mxu0 }
 0x1e8   : > { %v3914_v17 = vadd.f32 %v3911_v12, %v2946_v4  ;;  %v2367_v11 = vpop.f32.mrb[32].mxu1  ;;  %v2948_v18 = vpop.f32.mrb[29].mxu0 }
 0x1e9   : > { %v2369_v19 = vpop.f32.mrb[33].mxu1  ;;  %v2949_v53 = vpop.f32.mrb[30].mxu0  ;;  %v3923_v22 = vadd.f32 %v5005_v13, %v2367_v11 }
 0x1ea   : > { %3043 = vst [vmem:[%s5011_s28 + $0x70] sm:$0xff] %v3914_v17  ;;  %v3920_v3 = vadd.f32 %v3917_v10, %v2949_v53  ;;  %v2370_v21 = vpop.f32.mrb[34].mxu1  ;;  %v2951_v49 = vpop.f32.mrb[31].mxu0 }
 0x1eb   : > { %v2372_v39 = vpop.f32.mrb[35].mxu1  ;;  %v3929_v6 = vadd.f32 %v5005_v13, %v2370_v21 }
 0x1ec   : > { %3044 = vst [vmem:[%s5011_s28 + $0x78] sm:$0xff] %v3920_v3 }
 0x1ef   : > { %v2954_v9 = vpop.f32.mrb[32].mxu0 }
 0x1f0   : > { %v3926_v23 = vadd.f32 %v3923_v22, %v2954_v9  ;;  %v2375_v24 = vpop.f32.mrb[36].mxu1  ;;  %v2956_v25 = vpop.f32.mrb[33].mxu0 }
 0x1f1   : > { %v2377_v27 = vpop.f32.mrb[37].mxu1  ;;  %v2957_v29 = vpop.f32.mrb[34].mxu0  ;;  %v3935_v33 = vadd.f32 %v5005_v13, %v2375_v24 }
 0x1f2   : > { %3045 = vst [vmem:[%s5011_s28 + $0x80] sm:$0xff] %v3926_v23  ;;  %v3932_v31 = vadd.f32 %v3929_v6, %v2957_v29  ;;  %v2378_v1 = vpop.f32.mrb[38].mxu1  ;;  %v2959_v55 = vpop.f32.mrb[35].mxu0 }
 0x1f3   : > { %v2380_v32 = vpop.f32.mrb[39].mxu1  ;;  %v3941_v58 = vadd.f32 %v5005_v13, %v2378_v1 }
 0x1f4   : > { %3046 = vst [vmem:[%s5011_s28 + $0x88] sm:$0xff] %v3932_v31 }
 0x1f7   : > { %v2962_v35 = vpop.f32.mrb[36].mxu0 }
 0x1f8   : > { %v3938_v52 = vadd.f32 %v3935_v33, %v2962_v35  ;;  %v2383_v16 = vpop.f32.mrb[40].mxu1  ;;  %v2964_v51 = vpop.f32.mrb[37].mxu0 }
 0x1f9   : > { %v2385_v34 = vpop.f32.mrb[41].mxu1  ;;  %v2965_v7 = vpop.f32.mrb[38].mxu0  ;;  %v3947_v41 = vadd.f32 %v5005_v13, %v2383_v16 }
 0x1fa   : > { %3047 = vst [vmem:[%s5011_s28 + $0x90] sm:$0xff] %v3938_v52  ;;  %v3944_v14 = vadd.f32 %v3941_v58, %v2965_v7  ;;  %v2386_v38 = vpop.f32.mrb[42].mxu1  ;;  %v2967_v20 = vpop.f32.mrb[39].mxu0 }
 0x1fb   : > { %v2388_v28 = vpop.f32.mrb[43].mxu1  ;;  %v3953_v43 = vadd.f32 %v5005_v13, %v2386_v38 }
 0x1fc   : > { %3048 = vst [vmem:[%s5011_s28 + $0x98] sm:$0xff] %v3944_v14 }
 0x1ff   : > { %v2970_v45 = vpop.f32.mrb[40].mxu0 }
 0x200   : > { %v3950_v62 = vadd.f32 %v3947_v41, %v2970_v45  ;;  %v2391_v47 = vpop.f32.mrb[44].mxu1  ;;  %v2972_v46 = vpop.f32.mrb[41].mxu0 }
 0x201   : > { %v2393_v50 = vpop.f32.mrb[45].mxu1  ;;  %v2973_v0 = vpop.f32.mrb[42].mxu0  ;;  %v3959_v54 = vadd.f32 %v5005_v13, %v2391_v47 }
 0x202   : > { %3049 = vst [vmem:[%s5011_s28 + $0xa0] sm:$0xff] %v3950_v62  ;;  %v3956_v37 = vadd.f32 %v3953_v43, %v2973_v0  ;;  %v2394_v40 = vpop.f32.mrb[46].mxu1  ;;  %v2975_v8 = vpop.f32.mrb[43].mxu0 }
 0x203   : > { %v2396_v15 = vpop.f32.mrb[47].mxu1  ;;  %v3965_v57 = vadd.f32 %v5005_v13, %v2394_v40 }
 0x204   : > { %3050 = vst [vmem:[%s5011_s28 + $0xa8] sm:$0xff] %v3956_v37 }
 0x207   : > { %v2978_v56 = vpop.f32.mrb[44].mxu0 }
 0x208   : > { %v3962_v26 = vadd.f32 %v3959_v54, %v2978_v56  ;;  %v2399_v30 = vpop.f32.mrb[48].mxu1  ;;  %v2980_v60 = vpop.f32.mrb[45].mxu0 }
 0x209   : > { %v2401_v61 = vpop.f32.mrb[49].mxu1  ;;  %v2981_v59 = vpop.f32.mrb[46].mxu0  ;;  %v3971_v2 = vadd.f32 %v5005_v13, %v2399_v30 }
 0x20a   : > { %3051 = vst [vmem:[%s5011_s28 + $0xb0] sm:$0xff] %v3962_v26  ;;  %v3968_v63 = vadd.f32 %v3965_v57, %v2981_v59  ;;  %v2402_v36 = vpop.f32.mrb[50].mxu1  ;;  %v2983_v42 = vpop.f32.mrb[47].mxu0 }
 0x20b   : > { %v2404_v44 = vpop.f32.mrb[51].mxu1  ;;  %v3977_v5 = vadd.f32 %v5005_v13, %v2402_v36 }
 0x20c   : > { %3052 = vst [vmem:[%s5011_s28 + $0xb8] sm:$0xff] %v3968_v63 }
 0x20f   : > { %v2986_v48 = vpop.f32.mrb[48].mxu0 }
 0x210   : > { %v3974_v12 = vadd.f32 %v3971_v2, %v2986_v48  ;;  %v2407_v4 = vpop.f32.mrb[52].mxu1  ;;  %v2988_v10 = vpop.f32.mrb[49].mxu0 }
 0x211   : > { %v2409_v17 = vpop.f32.mrb[53].mxu1  ;;  %v2989_v11 = vpop.f32.mrb[50].mxu0  ;;  %v3983_v21 = vadd.f32 %v5005_v13, %v2407_v4 }
 0x212   : > { %3053 = vst [vmem:[%s5011_s28 + $0xc0] sm:$0xff] %v3974_v12  ;;  %v3980_v18 = vadd.f32 %v3977_v5, %v2989_v11  ;;  %v2410_v19 = vpop.f32.mrb[54].mxu1  ;;  %v2991_v53 = vpop.f32.mrb[51].mxu0 }
 0x213   : > { %v2412_v3 = vpop.f32.mrb[55].mxu1  ;;  %v3989_v39 = vadd.f32 %v5005_v13, %v2410_v19 }
 0x214   : > { %3054 = vst [vmem:[%s5011_s28 + $0xc8] sm:$0xff] %v3980_v18 }
 0x217   : > { %v2994_v49 = vpop.f32.mrb[52].mxu0 }
 0x218   : > { %v3986_v22 = vadd.f32 %v3983_v21, %v2994_v49  ;;  %v2996_v9 = vpop.f32.mrb[53].mxu0 }
 0x219   : > { %v2997_v6 = vpop.f32.mrb[54].mxu0 }
 0x21a   : > { %3055 = vst [vmem:[%s5011_s28 + $0xd0] sm:$0xff] %v3986_v22  ;;  %v3992_v23 = vadd.f32 %v3989_v39, %v2997_v6  ;;  %v2999_v24 = vpop.f32.mrb[55].mxu0 }
 0x21c   : > { %3056 = vst [vmem:[%s5011_s28 + $0xd8] sm:$0xff] %v3992_v23 }
 0x21d PF: > { %s15_s20 = sadd.s32 1, %s4178_s20   ;;  %s5085_s18 = smov %s4174_s19 }
 0x21e   : > { %p12_p5 = scmp.ge.s32.totalorder %s15_s20, 4   ;;  %s5086_s19 = smov %s5088_s21 }
 0x220   :  { %14 = sbr.rel (!%p12_p5) target bundleno = 2 (0x2), region = 81 }

</bundles_post_ra>
